<compile_context>
chip_gen: v6e
topology: v6e:2x2x1
jax: 0.10.0
libtpu: 0.0.40
codegen_flags: <defaults>
</compile_context>

<pallas_src>
import functools
import numpy as np
import jax
import jax.numpy as jnp
from jax.experimental import pallas as pl
from jax.experimental.pallas import tpu as pltpu


_KMAP = ((3, 1), (2, 0))   # kernel tap index used by sub-pixel (parity, shift)


# ----------------------------------------------------------------------------
# The single fused decoder kernel (one grid step == one batch element).
# ----------------------------------------------------------------------------
def _decoder_kernel(latent_dims, z_ref, wfc_ref, bfc_ref, m2_ref, l2_ref,
                    b2_ref, m1_ref, l1_ref, b1_ref, out_ref):
    b = pl.program_id(0)

    # ---- fc: latent dim is tiny (K=2) -> scalar x vector FMAs on the VPU.
    # x is the fc output laid out as the 7x7 image: (7, 7*2C), cols = w*2C + c.
    x = bfc_ref[...]                                            # (7, 7*2C)
    for l in range(latent_dims):
        x = x + z_ref[b, l] * wfc_ref[l]

    # ---- conv2: ConvTranspose2d(2C->C, k=4, s=2, p=1) + bias + ReLU.
    # 4 sub-pixel groups; each is  L2[g] @ (x @ M2[g]); rows land interleaved.
    h = b2_ref[...]                                             # (1, 14*C) bias row
    for g in range(4):
        y = jnp.dot(x, m2_ref[g], preferred_element_type=jnp.float32)       # (7, 14C)
        h = h + jnp.dot(l2_ref[g], y, preferred_element_type=jnp.float32)   # (14, 14C)
    h = jnp.maximum(h, 0.0)                                     # (14, 14*C)

    # ---- conv1: ConvTranspose2d(C->1, k=4, s=2, p=1) + bias + sigmoid.
    # Output is produced directly as the 28x28 image (no 1-wide MXU column).
    o = b1_ref[...]                                             # (1, 28) bias row
    for g in range(4):
        y = jnp.dot(h, m1_ref[g], preferred_element_type=jnp.float32)       # (14, 28)
        o = o + jnp.dot(l1_ref[g], y, preferred_element_type=jnp.float32)   # (28, 28)

    # sigmoid on EUP: exp + approximate reciprocal.
    out_ref[0] = pl.reciprocal(1.0 + jnp.exp(-o), approx=True)


# ----------------------------------------------------------------------------
# One-time (host / numpy) repack of the torch-layout parameters into the
# banded matrices consumed by the kernel.
# ----------------------------------------------------------------------------
def prepare_decoder_operands(params):
    fc_w = np.asarray(params["fc_w"], np.float32)     # (L, 2C*49)   (in, out)
    fc_b = np.asarray(params["fc_b"], np.float32)     # (2C*49,)
    w2 = np.asarray(params["conv2_w"], np.float32)    # (2C, C, 4, 4) torch layout
    b2 = np.asarray(params["conv2_b"], np.float32)    # (C,)
    w1 = np.asarray(params["conv1_w"], np.float32)    # (C, 1, 4, 4)
    b1 = np.asarray(params["conv1_b"], np.float32)    # (1,)

    L = fc_w.shape[0]
    C2, C = w2.shape[0], w2.shape[1]
    assert C2 == 2 * C and fc_w.shape[1] == C2 * 49

    # fc weight/bias reordered so the fc output is directly the (7, 7*2C)
    # NHWC-style image (cols = w*2C + c), matching torch's .view(B, 2C, 7, 7).
    wfc = fc_w.reshape(L, C2, 7, 7).transpose(0, 2, 3, 1).reshape(L, 7, 7 * C2)
    bfc = fc_b.reshape(C2, 7, 7).transpose(1, 2, 0).reshape(7, 7 * C2)

    # Width structure of a k=4,s=2,p=1 conv-transpose: S[w_in, w_out, kx] = 1
    # iff input column w_in contributes to output column w_out via tap kx.
    def width_structure(win):
        s_mat = np.zeros((win, 2 * win, 4), np.float32)
        for wo in range(2 * win):
            j, s = wo // 2, wo % 2
            for v in range(2):
                wi = j + s + v - 1
                if 0 <= wi < win:
                    s_mat[wi, wo, _KMAP[s][v]] = 1.0
        return s_mat

    # Height row-scatter for sub-pixel group (r, u): output row 2i+r gets
    # input row i+r+u-1 (zero-padding handled by dropping out-of-range rows).
    def height_select(hin, r, u):
        l_mat = np.zeros((2 * hin, hin), np.float32)
        for i in range(hin):
            hi = i + r + u - 1
            if 0 <= hi < hin:
                l_mat[2 * i + r, hi] = 1.0
        return l_mat

    sx2, sx1 = width_structure(7), width_structure(14)
    m2, l2, m1, l1 = [], [], [], []
    for r in range(2):
        for u in range(2):
            ky = _KMAP[r][u]
            # conv2 banded weights: rows = w_in*2C + ci, cols = w_out*C + co
            m2.append(np.einsum("wok,ick->wioc", sx2, w2[:, :, ky, :])
                      .reshape(7 * C2, 14 * C))
            l2.append(height_select(7, r, u))
            # conv1 banded weights: rows = w_in*C + c, cols = w_out (Cout = 1)
            m1.append(np.einsum("wok,ck->wco", sx1, w1[:, 0, ky, :])
                      .reshape(14 * C, 28))
            l1.append(height_select(14, r, u))

    return {
        "wfc": jnp.asarray(wfc),                                   # (L, 7, 7*2C)
        "bfc": jnp.asarray(bfc),                                   # (7, 7*2C)
        "m2": jnp.asarray(np.stack(m2)),                           # (4, 7*2C, 14*C)
        "l2": jnp.asarray(np.stack(l2)),                           # (4, 14, 7)
        "b2row": jnp.asarray(np.tile(b2, 14)[None, :]),            # (1, 14*C)
        "m1": jnp.asarray(np.stack(m1)),                           # (4, 14*C, 28)
        "l1": jnp.asarray(np.stack(l1)),                           # (4, 28, 14)
        "b1row": jnp.asarray(np.full((1, 28), b1[0], np.float32)),  # (1, 28)
    }


# ----------------------------------------------------------------------------
# Forward: a single pallas_call + a free reshape to NCHW.
# ----------------------------------------------------------------------------
def decoder_forward(z, ops):
    B, L = z.shape
    C2 = ops["bfc"].shape[1] // 7
    C = C2 // 2

    out = pl.pallas_call(
        functools.partial(_decoder_kernel, L),
        out_shape=jax.ShapeDtypeStruct((B, 28, 28), jnp.float32),
        grid=(B,),
        in_specs=[
            pl.BlockSpec(memory_space=pltpu.MemorySpace.SMEM),         # z (B, L)
            pl.BlockSpec((L, 7, 7 * C2), lambda b: (0, 0, 0)),         # wfc
            pl.BlockSpec((7, 7 * C2), lambda b: (0, 0)),               # bfc
            pl.BlockSpec((4, 7 * C2, 14 * C), lambda b: (0, 0, 0)),    # m2
            pl.BlockSpec((4, 14, 7), lambda b: (0, 0, 0)),             # l2
            pl.BlockSpec((1, 14 * C), lambda b: (0, 0)),               # b2row
            pl.BlockSpec((4, 14 * C, 28), lambda b: (0, 0, 0)),        # m1
            pl.BlockSpec((4, 28, 14), lambda b: (0, 0, 0)),            # l1
            pl.BlockSpec((1, 28), lambda b: (0, 0)),                   # b1row
        ],
        out_specs=pl.BlockSpec((1, 28, 28), lambda b: (b, 0, 0)),
        compiler_params=pltpu.CompilerParams(
            dimension_semantics=("parallel",)),   # batch splits across v7x TCs
    )(z.astype(jnp.float32), ops["wfc"], ops["bfc"], ops["m2"], ops["l2"],
      ops["b2row"], ops["m1"], ops["l1"], ops["b1row"])

    return out.reshape(B, 1, 28, 28)              # NCHW, channel dim is 1


# ----------------------------------------------------------------------------
# Parameter init (same layout/content conventions as torch).
# ----------------------------------------------------------------------------
def init_params(key, capacity, latent_dims):
    C = capacity
    ks = jax.random.split(key, 6)

    def u(k, shape, fan_in):
        bound = 1.0 / np.sqrt(fan_in)
        return jax.random.uniform(k, shape, jnp.float32, -bound, bound)

    fc_out = 2 * C * 7 * 7
    return {
        "fc_w": u(ks[0], (latent_dims, fc_out), latent_dims),   # stored (in, out)
        "fc_b": u(ks[1], (fc_out,), latent_dims),
        "conv2_w": u(ks[2], (2 * C, C, 4, 4), 2 * C * 16),      # torch (Cin, Cout, kH, kW)
        "conv2_b": u(ks[3], (C,), 2 * C * 16),
        "conv1_w": u(ks[4], (C, 1, 4, 4), C * 16),
        "conv1_b": u(ks[5], (1,), C * 16),
    }


# ----------------------------------------------------------------------------
# Pure-numpy reference (mirrors torch ConvTranspose2d semantics exactly).
# ----------------------------------------------------------------------------
def _ref_conv_transpose(x, w, b, stride=2, pad=1):
    B, Ci, H, Wd = x.shape
    Co, k = w.shape[1], w.shape[2]
    OH, OW = (H - 1) * stride + k, (Wd - 1) * stride + k
    y = np.zeros((B, Co, OH, OW), np.float32)
    contrib = np.einsum("bihw,iokl->bohwkl", x, w)
    for ky in range(k):
        for kx in range(k):
            y[:, :, ky:ky + (H - 1) * stride + 1:stride,
                    kx:kx + (Wd - 1) * stride + 1:stride] += contrib[:, :, :, :, ky, kx]
    y = y[:, :, pad:OH - pad, pad:OW - pad]
    return y + b[None, :, None, None]


def _ref_decoder(z, p, capacity):
    C = capacity
    h = z @ p["fc_w"] + p["fc_b"]
    h = h.reshape(z.shape[0], 2 * C, 7, 7)
    h = np.maximum(_ref_conv_transpose(h, p["conv2_w"], p["conv2_b"]), 0.0)
    y = _ref_conv_transpose(h, p["conv1_w"], p["conv1_b"])
    return 1.0 / (1.0 + np.exp(-y))


if __name__ == "__main__":
    CAPACITY = 16     # small capacity (module default is 64); architecture identical
    LATENT = 2
    BATCH = 2

    key = jax.random.PRNGKey(0)
    pkey, xkey = jax.random.split(key)
    params = init_params(pkey, CAPACITY, LATENT)
    z = jax.random.normal(xkey, (BATCH, LATENT), jnp.float32)

    ops = prepare_decoder_operands(params)        # one-time host-side weight repack
    fwd = jax.jit(decoder_forward)
    out = jax.block_until_ready(fwd(z, ops))
    assert out.shape == (BATCH, 1, 28, 28), out.shape

    # Sanity check against a pure-numpy reference (loose tol: MXU f32 matmuls
    # may use reduced-precision passes; approx reciprocal in the sigmoid).
    p_np = {k: np.asarray(v) for k, v in params.items()}
    ref = _ref_decoder(np.asarray(z), p_np, CAPACITY)
    err = float(np.max(np.abs(np.asarray(out) - ref)))
    assert err < 5e-2, f"max abs err {err}"

    print("KERNEL_OK")
</pallas_src>

<mosaic_0001>
module attributes {stable_mosaic.version = 11 : i64} {
  func.func @_decoder_kernel(%arg0: i32, %arg1: memref<2x2xf32, #tpu.memory_space<smem>>, %arg2: memref<2x7x224xf32, #tpu.memory_space<vmem>>, %arg3: memref<7x224xf32, #tpu.memory_space<vmem>>, %arg4: memref<4x224x224xf32, #tpu.memory_space<vmem>>, %arg5: memref<4x14x7xf32, #tpu.memory_space<vmem>>, %arg6: memref<1x224xf32, #tpu.memory_space<vmem>>, %arg7: memref<4x224x28xf32, #tpu.memory_space<vmem>>, %arg8: memref<4x28x14xf32, #tpu.memory_space<vmem>>, %arg9: memref<1x28xf32, #tpu.memory_space<vmem>>, %arg10: memref<1x28x28xf32, #tpu.memory_space<vmem>>) attributes {dimension_semantics = [#tpu.dimension_semantics<parallel>], iteration_bounds = array<i64: 2>, scalar_prefetch = 0 : i64, scratch_operands = 0 : i64, tpu.core_type = #tpu.core_type<tc>, window_params = [{transform_indices = @transform_0, window_bounds = array<i64: 2, 2>}, {pipeline_mode = #tpu.pipeline_mode<synchronous>, transform_indices = @transform_1, window_bounds = array<i64: 2, 7, 224>}, {pipeline_mode = #tpu.pipeline_mode<synchronous>, transform_indices = @transform_2, window_bounds = array<i64: 7, 224>}, {pipeline_mode = #tpu.pipeline_mode<synchronous>, transform_indices = @transform_3, window_bounds = array<i64: 4, 224, 224>}, {pipeline_mode = #tpu.pipeline_mode<synchronous>, transform_indices = @transform_4, window_bounds = array<i64: 4, 14, 7>}, {pipeline_mode = #tpu.pipeline_mode<synchronous>, transform_indices = @transform_5, window_bounds = array<i64: 1, 224>}, {pipeline_mode = #tpu.pipeline_mode<synchronous>, transform_indices = @transform_6, window_bounds = array<i64: 4, 224, 28>}, {pipeline_mode = #tpu.pipeline_mode<synchronous>, transform_indices = @transform_7, window_bounds = array<i64: 4, 28, 14>}, {pipeline_mode = #tpu.pipeline_mode<synchronous>, transform_indices = @transform_8, window_bounds = array<i64: 1, 28>}, {transform_indices = @transform_9, window_bounds = array<i64: 1, 28, 28>}]} {
    %c0 = arith.constant 0 : index
    %c0_0 = arith.constant 0 : index
    %0 = vector.load %arg3[%c0, %c0_0] : memref<7x224xf32, #tpu.memory_space<vmem>>, vector<7x224xf32>
    %1 = arith.index_cast %arg0 : i32 to index
    %c0_1 = arith.constant 0 : index
    %2 = memref.load %arg1[%1, %c0_1] : memref<2x2xf32, #tpu.memory_space<smem>>
    %c0_2 = arith.constant 0 : index
    %c0_3 = arith.constant 0 : index
    %c0_4 = arith.constant 0 : index
    %3 = vector.load %arg2[%c0_2, %c0_3, %c0_4] : memref<2x7x224xf32, #tpu.memory_space<vmem>>, vector<1x7x224xf32>
    %4 = vector.shape_cast %3 : vector<1x7x224xf32> to vector<7x224xf32>
    %5 = vector.broadcast %2 : f32 to vector<7x224xf32>
    %6 = arith.mulf %5, %4 : vector<7x224xf32>
    %7 = arith.addf %0, %6 : vector<7x224xf32>
    %8 = arith.index_cast %arg0 : i32 to index
    %c1 = arith.constant 1 : index
    %9 = memref.load %arg1[%8, %c1] : memref<2x2xf32, #tpu.memory_space<smem>>
    %c1_5 = arith.constant 1 : index
    %c0_6 = arith.constant 0 : index
    %c0_7 = arith.constant 0 : index
    %10 = vector.load %arg2[%c1_5, %c0_6, %c0_7] : memref<2x7x224xf32, #tpu.memory_space<vmem>>, vector<1x7x224xf32>
    %11 = vector.shape_cast %10 : vector<1x7x224xf32> to vector<7x224xf32>
    %12 = vector.broadcast %9 : f32 to vector<7x224xf32>
    %13 = arith.mulf %12, %11 : vector<7x224xf32>
    %14 = arith.addf %7, %13 : vector<7x224xf32>
    %c0_8 = arith.constant 0 : index
    %c0_9 = arith.constant 0 : index
    %15 = vector.load %arg6[%c0_8, %c0_9] : memref<1x224xf32, #tpu.memory_space<vmem>>, vector<1x224xf32>
    %c0_10 = arith.constant 0 : index
    %c0_11 = arith.constant 0 : index
    %c0_12 = arith.constant 0 : index
    %16 = vector.load %arg4[%c0_10, %c0_11, %c0_12] : memref<4x224x224xf32, #tpu.memory_space<vmem>>, vector<1x224x224xf32>
    %17 = vector.shape_cast %16 : vector<1x224x224xf32> to vector<224x224xf32>
    %cst = arith.constant dense<0.000000e+00> : vector<7x224xf32>
    %18 = tpu.matmul %14, %17, %cst {dimension_numbers = #tpu.dot_dimension_numbers<[1], [0], [0], [1], [0, 0, 1, 1], [], []>} : vector<7x224xf32>, vector<224x224xf32>, vector<7x224xf32> -> vector<7x224xf32>
    %c0_13 = arith.constant 0 : index
    %c0_14 = arith.constant 0 : index
    %c0_15 = arith.constant 0 : index
    %19 = vector.load %arg5[%c0_13, %c0_14, %c0_15] : memref<4x14x7xf32, #tpu.memory_space<vmem>>, vector<1x14x7xf32>
    %20 = vector.shape_cast %19 : vector<1x14x7xf32> to vector<14x7xf32>
    %cst_16 = arith.constant dense<0.000000e+00> : vector<14x224xf32>
    %21 = tpu.matmul %20, %18, %cst_16 {dimension_numbers = #tpu.dot_dimension_numbers<[1], [0], [0], [1], [0, 0, 1, 1], [], []>} : vector<14x7xf32>, vector<7x224xf32>, vector<14x224xf32> -> vector<14x224xf32>
    %22 = vector.broadcast %15 : vector<1x224xf32> to vector<14x224xf32>
    %23 = arith.addf %22, %21 : vector<14x224xf32>
    %c1_17 = arith.constant 1 : index
    %c0_18 = arith.constant 0 : index
    %c0_19 = arith.constant 0 : index
    %24 = vector.load %arg4[%c1_17, %c0_18, %c0_19] : memref<4x224x224xf32, #tpu.memory_space<vmem>>, vector<1x224x224xf32>
    %25 = vector.shape_cast %24 : vector<1x224x224xf32> to vector<224x224xf32>
    %cst_20 = arith.constant dense<0.000000e+00> : vector<7x224xf32>
    %26 = tpu.matmul %14, %25, %cst_20 {dimension_numbers = #tpu.dot_dimension_numbers<[1], [0], [0], [1], [0, 0, 1, 1], [], []>} : vector<7x224xf32>, vector<224x224xf32>, vector<7x224xf32> -> vector<7x224xf32>
    %c1_21 = arith.constant 1 : index
    %c0_22 = arith.constant 0 : index
    %c0_23 = arith.constant 0 : index
    %27 = vector.load %arg5[%c1_21, %c0_22, %c0_23] : memref<4x14x7xf32, #tpu.memory_space<vmem>>, vector<1x14x7xf32>
    %28 = vector.shape_cast %27 : vector<1x14x7xf32> to vector<14x7xf32>
    %cst_24 = arith.constant dense<0.000000e+00> : vector<14x224xf32>
    %29 = tpu.matmul %28, %26, %cst_24 {dimension_numbers = #tpu.dot_dimension_numbers<[1], [0], [0], [1], [0, 0, 1, 1], [], []>} : vector<14x7xf32>, vector<7x224xf32>, vector<14x224xf32> -> vector<14x224xf32>
    %30 = arith.addf %23, %29 : vector<14x224xf32>
    %c2 = arith.constant 2 : index
    %c0_25 = arith.constant 0 : index
    %c0_26 = arith.constant 0 : index
    %31 = vector.load %arg4[%c2, %c0_25, %c0_26] : memref<4x224x224xf32, #tpu.memory_space<vmem>>, vector<1x224x224xf32>
    %32 = vector.shape_cast %31 : vector<1x224x224xf32> to vector<224x224xf32>
    %cst_27 = arith.constant dense<0.000000e+00> : vector<7x224xf32>
    %33 = tpu.matmul %14, %32, %cst_27 {dimension_numbers = #tpu.dot_dimension_numbers<[1], [0], [0], [1], [0, 0, 1, 1], [], []>} : vector<7x224xf32>, vector<224x224xf32>, vector<7x224xf32> -> vector<7x224xf32>
    %c2_28 = arith.constant 2 : index
    %c0_29 = arith.constant 0 : index
    %c0_30 = arith.constant 0 : index
    %34 = vector.load %arg5[%c2_28, %c0_29, %c0_30] : memref<4x14x7xf32, #tpu.memory_space<vmem>>, vector<1x14x7xf32>
    %35 = vector.shape_cast %34 : vector<1x14x7xf32> to vector<14x7xf32>
    %cst_31 = arith.constant dense<0.000000e+00> : vector<14x224xf32>
    %36 = tpu.matmul %35, %33, %cst_31 {dimension_numbers = #tpu.dot_dimension_numbers<[1], [0], [0], [1], [0, 0, 1, 1], [], []>} : vector<14x7xf32>, vector<7x224xf32>, vector<14x224xf32> -> vector<14x224xf32>
    %37 = arith.addf %30, %36 : vector<14x224xf32>
    %c3 = arith.constant 3 : index
    %c0_32 = arith.constant 0 : index
    %c0_33 = arith.constant 0 : index
    %38 = vector.load %arg4[%c3, %c0_32, %c0_33] : memref<4x224x224xf32, #tpu.memory_space<vmem>>, vector<1x224x224xf32>
    %39 = vector.shape_cast %38 : vector<1x224x224xf32> to vector<224x224xf32>
    %cst_34 = arith.constant dense<0.000000e+00> : vector<7x224xf32>
    %40 = tpu.matmul %14, %39, %cst_34 {dimension_numbers = #tpu.dot_dimension_numbers<[1], [0], [0], [1], [0, 0, 1, 1], [], []>} : vector<7x224xf32>, vector<224x224xf32>, vector<7x224xf32> -> vector<7x224xf32>
    %c3_35 = arith.constant 3 : index
    %c0_36 = arith.constant 0 : index
    %c0_37 = arith.constant 0 : index
    %41 = vector.load %arg5[%c3_35, %c0_36, %c0_37] : memref<4x14x7xf32, #tpu.memory_space<vmem>>, vector<1x14x7xf32>
    %42 = vector.shape_cast %41 : vector<1x14x7xf32> to vector<14x7xf32>
    %cst_38 = arith.constant dense<0.000000e+00> : vector<14x224xf32>
    %43 = tpu.matmul %42, %40, %cst_38 {dimension_numbers = #tpu.dot_dimension_numbers<[1], [0], [0], [1], [0, 0, 1, 1], [], []>} : vector<14x7xf32>, vector<7x224xf32>, vector<14x224xf32> -> vector<14x224xf32>
    %44 = arith.addf %37, %43 : vector<14x224xf32>
    %cst_39 = arith.constant 0.000000e+00 : f32
    %45 = vector.broadcast %cst_39 : f32 to vector<14x224xf32>
    %46 = arith.maximumf %44, %45 : vector<14x224xf32>
    %c0_40 = arith.constant 0 : index
    %c0_41 = arith.constant 0 : index
    %47 = vector.load %arg9[%c0_40, %c0_41] : memref<1x28xf32, #tpu.memory_space<vmem>>, vector<1x28xf32>
    %c0_42 = arith.constant 0 : index
    %c0_43 = arith.constant 0 : index
    %c0_44 = arith.constant 0 : index
    %48 = vector.load %arg7[%c0_42, %c0_43, %c0_44] : memref<4x224x28xf32, #tpu.memory_space<vmem>>, vector<1x224x28xf32>
    %49 = vector.shape_cast %48 : vector<1x224x28xf32> to vector<224x28xf32>
    %cst_45 = arith.constant dense<0.000000e+00> : vector<14x28xf32>
    %50 = tpu.matmul %46, %49, %cst_45 {dimension_numbers = #tpu.dot_dimension_numbers<[1], [0], [0], [1], [0, 0, 1, 1], [], []>} : vector<14x224xf32>, vector<224x28xf32>, vector<14x28xf32> -> vector<14x28xf32>
    %c0_46 = arith.constant 0 : index
    %c0_47 = arith.constant 0 : index
    %c0_48 = arith.constant 0 : index
    %51 = vector.load %arg8[%c0_46, %c0_47, %c0_48] : memref<4x28x14xf32, #tpu.memory_space<vmem>>, vector<1x28x14xf32>
    %52 = vector.shape_cast %51 : vector<1x28x14xf32> to vector<28x14xf32>
    %cst_49 = arith.constant dense<0.000000e+00> : vector<28x28xf32>
    %53 = tpu.matmul %52, %50, %cst_49 {dimension_numbers = #tpu.dot_dimension_numbers<[1], [0], [0], [1], [0, 0, 1, 1], [], []>} : vector<28x14xf32>, vector<14x28xf32>, vector<28x28xf32> -> vector<28x28xf32>
    %54 = vector.broadcast %47 : vector<1x28xf32> to vector<28x28xf32>
    %55 = arith.addf %54, %53 : vector<28x28xf32>
    %c1_50 = arith.constant 1 : index
    %c0_51 = arith.constant 0 : index
    %c0_52 = arith.constant 0 : index
    %56 = vector.load %arg7[%c1_50, %c0_51, %c0_52] : memref<4x224x28xf32, #tpu.memory_space<vmem>>, vector<1x224x28xf32>
    %57 = vector.shape_cast %56 : vector<1x224x28xf32> to vector<224x28xf32>
    %cst_53 = arith.constant dense<0.000000e+00> : vector<14x28xf32>
    %58 = tpu.matmul %46, %57, %cst_53 {dimension_numbers = #tpu.dot_dimension_numbers<[1], [0], [0], [1], [0, 0, 1, 1], [], []>} : vector<14x224xf32>, vector<224x28xf32>, vector<14x28xf32> -> vector<14x28xf32>
    %c1_54 = arith.constant 1 : index
    %c0_55 = arith.constant 0 : index
    %c0_56 = arith.constant 0 : index
    %59 = vector.load %arg8[%c1_54, %c0_55, %c0_56] : memref<4x28x14xf32, #tpu.memory_space<vmem>>, vector<1x28x14xf32>
    %60 = vector.shape_cast %59 : vector<1x28x14xf32> to vector<28x14xf32>
    %cst_57 = arith.constant dense<0.000000e+00> : vector<28x28xf32>
    %61 = tpu.matmul %60, %58, %cst_57 {dimension_numbers = #tpu.dot_dimension_numbers<[1], [0], [0], [1], [0, 0, 1, 1], [], []>} : vector<28x14xf32>, vector<14x28xf32>, vector<28x28xf32> -> vector<28x28xf32>
    %62 = arith.addf %55, %61 : vector<28x28xf32>
    %c2_58 = arith.constant 2 : index
    %c0_59 = arith.constant 0 : index
    %c0_60 = arith.constant 0 : index
    %63 = vector.load %arg7[%c2_58, %c0_59, %c0_60] : memref<4x224x28xf32, #tpu.memory_space<vmem>>, vector<1x224x28xf32>
    %64 = vector.shape_cast %63 : vector<1x224x28xf32> to vector<224x28xf32>
    %cst_61 = arith.constant dense<0.000000e+00> : vector<14x28xf32>
    %65 = tpu.matmul %46, %64, %cst_61 {dimension_numbers = #tpu.dot_dimension_numbers<[1], [0], [0], [1], [0, 0, 1, 1], [], []>} : vector<14x224xf32>, vector<224x28xf32>, vector<14x28xf32> -> vector<14x28xf32>
    %c2_62 = arith.constant 2 : index
    %c0_63 = arith.constant 0 : index
    %c0_64 = arith.constant 0 : index
    %66 = vector.load %arg8[%c2_62, %c0_63, %c0_64] : memref<4x28x14xf32, #tpu.memory_space<vmem>>, vector<1x28x14xf32>
    %67 = vector.shape_cast %66 : vector<1x28x14xf32> to vector<28x14xf32>
    %cst_65 = arith.constant dense<0.000000e+00> : vector<28x28xf32>
    %68 = tpu.matmul %67, %65, %cst_65 {dimension_numbers = #tpu.dot_dimension_numbers<[1], [0], [0], [1], [0, 0, 1, 1], [], []>} : vector<28x14xf32>, vector<14x28xf32>, vector<28x28xf32> -> vector<28x28xf32>
    %69 = arith.addf %62, %68 : vector<28x28xf32>
    %c3_66 = arith.constant 3 : index
    %c0_67 = arith.constant 0 : index
    %c0_68 = arith.constant 0 : index
    %70 = vector.load %arg7[%c3_66, %c0_67, %c0_68] : memref<4x224x28xf32, #tpu.memory_space<vmem>>, vector<1x224x28xf32>
    %71 = vector.shape_cast %70 : vector<1x224x28xf32> to vector<224x28xf32>
    %cst_69 = arith.constant dense<0.000000e+00> : vector<14x28xf32>
    %72 = tpu.matmul %46, %71, %cst_69 {dimension_numbers = #tpu.dot_dimension_numbers<[1], [0], [0], [1], [0, 0, 1, 1], [], []>} : vector<14x224xf32>, vector<224x28xf32>, vector<14x28xf32> -> vector<14x28xf32>
    %c3_70 = arith.constant 3 : index
    %c0_71 = arith.constant 0 : index
    %c0_72 = arith.constant 0 : index
    %73 = vector.load %arg8[%c3_70, %c0_71, %c0_72] : memref<4x28x14xf32, #tpu.memory_space<vmem>>, vector<1x28x14xf32>
    %74 = vector.shape_cast %73 : vector<1x28x14xf32> to vector<28x14xf32>
    %cst_73 = arith.constant dense<0.000000e+00> : vector<28x28xf32>
    %75 = tpu.matmul %74, %72, %cst_73 {dimension_numbers = #tpu.dot_dimension_numbers<[1], [0], [0], [1], [0, 0, 1, 1], [], []>} : vector<28x14xf32>, vector<14x28xf32>, vector<28x28xf32> -> vector<28x28xf32>
    %76 = arith.addf %69, %75 : vector<28x28xf32>
    %cst_74 = arith.constant 0.000000e+00 : f32
    %77 = vector.broadcast %cst_74 : f32 to vector<28x28xf32>
    %78 = arith.subf %77, %76 : vector<28x28xf32>
    %79 = math.exp %78 : vector<28x28xf32>
    %cst_75 = arith.constant 1.000000e+00 : f32
    %80 = vector.broadcast %cst_75 : f32 to vector<28x28xf32>
    %81 = arith.addf %80, %79 : vector<28x28xf32>
    %82 = tpu.reciprocal %81 {approx = true} : vector<28x28xf32> -> vector<28x28xf32>
    %c0_76 = arith.constant 0 : index
    %c0_77 = arith.constant 0 : index
    %c0_78 = arith.constant 0 : index
    %83 = vector.load %arg10[%c0_76, %c0_77, %c0_78] : memref<1x28x28xf32, #tpu.memory_space<vmem>>, vector<1x28x28xf32>
    %84 = vector.shape_cast %83 : vector<1x28x28xf32> to vector<28x28xf32>
    %85 = vector.shape_cast %82 : vector<28x28xf32> to vector<1x28x28xf32>
    tpu.vector_store %arg10[%c0_76, %c0_77, %c0_78], %85 {strides = array<i32>} : memref<1x28x28xf32, #tpu.memory_space<vmem>>, vector<1x28x28xf32>,
    return
  }
  func.func @transform_0(%arg0: i32) -> (i32, i32) {
    %c0_i32 = arith.constant 0 : i32
    %c0_i32_0 = arith.constant 0 : i32
    %c0_i32_1 = arith.constant 0 : i32
    return %c0_i32, %c0_i32_0 : i32, i32
  }
  func.func @transform_1(%arg0: i32) -> (i32, i32, i32) {
    %c0_i32 = arith.constant 0 : i32
    %c0_i32_0 = arith.constant 0 : i32
    %c0_i32_1 = arith.constant 0 : i32
    %c0_i32_2 = arith.constant 0 : i32
    return %c0_i32, %c0_i32_0, %c0_i32_1 : i32, i32, i32
  }
  func.func @transform_2(%arg0: i32) -> (i32, i32) {
    %c0_i32 = arith.constant 0 : i32
    %c0_i32_0 = arith.constant 0 : i32
    %c0_i32_1 = arith.constant 0 : i32
    return %c0_i32, %c0_i32_0 : i32, i32
  }
  func.func @transform_3(%arg0: i32) -> (i32, i32, i32) {
    %c0_i32 = arith.constant 0 : i32
    %c0_i32_0 = arith.constant 0 : i32
    %c0_i32_1 = arith.constant 0 : i32
    %c0_i32_2 = arith.constant 0 : i32
    return %c0_i32, %c0_i32_0, %c0_i32_1 : i32, i32, i32
  }
  func.func @transform_4(%arg0: i32) -> (i32, i32, i32) {
    %c0_i32 = arith.constant 0 : i32
    %c0_i32_0 = arith.constant 0 : i32
    %c0_i32_1 = arith.constant 0 : i32
    %c0_i32_2 = arith.constant 0 : i32
    return %c0_i32, %c0_i32_0, %c0_i32_1 : i32, i32, i32
  }
  func.func @transform_5(%arg0: i32) -> (i32, i32) {
    %c0_i32 = arith.constant 0 : i32
    %c0_i32_0 = arith.constant 0 : i32
    %c0_i32_1 = arith.constant 0 : i32
    return %c0_i32, %c0_i32_0 : i32, i32
  }
  func.func @transform_6(%arg0: i32) -> (i32, i32, i32) {
    %c0_i32 = arith.constant 0 : i32
    %c0_i32_0 = arith.constant 0 : i32
    %c0_i32_1 = arith.constant 0 : i32
    %c0_i32_2 = arith.constant 0 : i32
    return %c0_i32, %c0_i32_0, %c0_i32_1 : i32, i32, i32
  }
  func.func @transform_7(%arg0: i32) -> (i32, i32, i32) {
    %c0_i32 = arith.constant 0 : i32
    %c0_i32_0 = arith.constant 0 : i32
    %c0_i32_1 = arith.constant 0 : i32
    %c0_i32_2 = arith.constant 0 : i32
    return %c0_i32, %c0_i32_0, %c0_i32_1 : i32, i32, i32
  }
  func.func @transform_8(%arg0: i32) -> (i32, i32) {
    %c0_i32 = arith.constant 0 : i32
    %c0_i32_0 = arith.constant 0 : i32
    %c0_i32_1 = arith.constant 0 : i32
    return %c0_i32, %c0_i32_0 : i32, i32
  }
  func.func @transform_9(%arg0: i32) -> (i32, i32, i32) {
    %c0_i32 = arith.constant 0 : i32
    %c0_i32_0 = arith.constant 0 : i32
    %c0_i32_1 = arith.constant 0 : i32
    return %arg0, %c0_i32, %c0_i32_0 : i32, i32, i32
  }
}

</mosaic_0001>

<bundles_post_ra>
// kernel: decoder_forward.1
= control target key start
LH: loop header
LB: loop body
LE: loop exit
PB: predicated region body
PF: predicated region fallthrough
CT: control target
= control target key end

     0   :  { %14 = vsyncpa [#allocation4], 0  ;;  %s3384_s0 = inlined_call_operand.vmem [shape: f32[2,2], index: 0, kind: input, shape index: {}]   ;;  %s3385_s1 = inlined_call_operand.vmem [shape: f32[2,7,224], index: 1, kind: input, shape index: {}]   ;;  %s3386_s2 = inlined_call_operand.vmem [shape: f32[7,224], index: 2, kind: input, shape index: {}]   ;;  %s3387_s3 = inlined_call_operand.hbm [shape: f32[4,224,224], index: 3, kind: input, shape index: {}]   ;;  %s3388_s4 = inlined_call_operand.vmem [shape: f32[4,14,7], index: 4, kind: input, shape index: {}]   ;;  %s3389_s5 = inlined_call_operand.vmem [shape: f32[1,224], index: 5, kind: input, shape index: {}]   ;;  %s3390_s6 = inlined_call_operand.vmem [shape: f32[4,224,28], index: 6, kind: input, shape index: {}]   ;;  %s3391_s7 = inlined_call_operand.vmem [shape: f32[4,28,14], index: 7, kind: input, shape index: {}]   ;;  %s3392_s8 = inlined_call_operand.vmem [shape: f32[1,28], index: 8, kind: input, shape index: {}]   ;;  %s3393_s9 = inlined_call_operand.vmem [shape: f32[2,28,28], index: 9, kind: output, shape index: {}]  }
   0x1   :  { %15 = vsyncpa [#allocation3], 0  ;;  %s2628_s30 = smov 0  }
   0x2 LB: > { %s2634_s10 = sadd.s32 4294967295, %s2571_s30   ;;  %p2239_p0 = scmp.ge.s32.totalorder %s2571_s30, 1  ;;  %s2571_s30 = sphi %s2628_s30, %s21_s30  }
   0x3   : > { %p241_p1 = scmp.lt.s32.totalorder %s2571_s30, 3  ;;  %p3394_p2 = scmp.eq.s32.totalorder %s2634_s10, 0 }
   0x4   : > { %s254_s13 = sshll.u32 %s3384_s0, 4  ;;  %s2573_s15 = smov [#allocation5]   ;;  %s255_s13 = int_to_ptr.vmem [resolvable:$true] %s254_s13 }
   0x5   : > { %p2642_p3 = pnand %p2239_p0, %p241_p1  ;;  %s270_s16 = sshll.u32 %s2573_s15, 4  ;;  %s271_s16 = int_to_ptr.vmem [resolvable:$true] %s270_s16 }
   0x6   : > { %s2516_s18 = scalar_lea.vmem %s255_s13, 32  ;;  %p2524_p10 = scmp.lt.s32.totalorder %s255_s13, %s255_s13 }
   0x7   : > { %s3396_s14 = scalar_select %p2642_p3, 1, 0 }
   0x8   : > { %p2476_p4 = pneg %p2642_p3  ;;  %p2517_p6 = scmp.ne.s32.totalorder %s255_s13, %s2516_s18 }
   0x9   : > { %p2525_p11 = scmp.lt.s32.totalorder %s2516_s18, %s2516_s18 }
   0xa   : > { %p2650_p5 = pnand %p3394_p2, %p2476_p4 }
   0xb   : > { %p2526_p12 = por %p2525_p11, %p2524_p10 }
   0xc   : > { %p2518_p7 = pneg %p2650_p5 }
   0xe   : > { %p2519_p8 = pnand %p2518_p7, %p2517_p6 }
  0x10   : > { %p2520_p9 = pneg %p2519_p8 }
  0x12   : > { %p2527_p13 = pnand %p2526_p12, %p2520_p9 }
  0x14   : > { %2530 = shalt.err (!%p2527_p13)
}
  0x15   : > { %s2574_s19 = smov [#allocation2]   ;;  %s2542_s20 = scalar_lea.vmem %s271_s16, 28672 }
  0x16   : > { %2479 = dma.vmem_to_smem (!%p2650_p5), %s255_s13, 32, %s2574_s19, [#allocation4]  }
  0x17   : > { %p2543_p0 = scmp.ne.s32.totalorder %s271_s16, %s2542_s20  ;;  %p2550_p2 = scmp.lt.s32.totalorder %s271_s16, %s271_s16 }
  0x18   : > { %p2551_p3 = scmp.lt.s32.totalorder %s2542_s20, %s2542_s20 }
  0x19   : > { %p2545_p1 = pnand %p2543_p0, %p2518_p7 }
  0x1a   : > { %p2552_p6 = por %p2551_p3, %p2550_p2 }
  0x1b   : > { %p2546_p4 = pneg %p2545_p1 }
  0x1d   : > { %p2553_p8 = pnand %p2552_p6, %p2546_p4 }
  0x1f   : > { %2556 = shalt.err (!%p2553_p8)
}
  0x20   : > { %s2575_s21 = smov 256   ;;  %s2576_s22 = smov 16  }
  0x21   : > { %2482 = dma.hbm_to_vmem [thread:$0]  (!%p2650_p5), %s3387_s3, 28672, %s271_s16, [#allocation3], %s2575_s21, %s2575_s21, %s2576_s22  }
  0x22   : > { %p3398_p9 = scmp.ne.s32.totalorder %s3396_s14, 0 }
  0x23   : > { %p3399_p10 = scmp.eq.s32.totalorder (!%p3398_p9), %s2634_s10, 0 }
  0x24   : > { %301 = sbr.rel (%p3398_p9) target bundleno = 2273 (0x8e1), region = 56 }
  0x29   : > { %2562 = dma.done.wait (%p3399_p10), [#allocation4], 32   ;;  %p3400_p7 = pmov %p3399_p10 }
  0x2b   : > { %2564 = vsyncadd (%p3400_p7), [#allocation4], 4294967264  ;;  %p3401_p2 = pmov %p3400_p7 }
  0x2d   : > { %2566 = dma.done.wait (%p3401_p2), [#allocation3], 28672   ;;  %p3402_p3 = pmov %p3401_p2 }
  0x2f   : > { %2568 = vsyncadd (%p3402_p3), [#allocation3], 4294938624 }
  0x30   : > { %311 = sfence }
  0x31   : > { %v395_v0 = vld [vmem:[#allocation5 + $0xf8] sm:$0xff]  ;;  %v394_v1 = vld [vmem:[#allocation5 + $0xf0] sm:$0xff]  ;;  %v393_v2 = vld [vmem:[#allocation5 + $0xe8] sm:$0xff]  ;;  %s2247_s25 = sshll.u32 %s2634_s10, 7  ;;  %vm420_vm0 = vcmask 785408   ;;  %vm504_vm1 = vcmask 1046528  }
  0x32   : > { %424 = vmatprep.subr.mxu0 %v395_v0  ;;  %v392_v3 = vld [vmem:[#allocation5 + $0xe0] sm:$0xff]  ;;  %v391_v4 = vld [vmem:[#allocation5 + $0xd8] sm:$0xff]  ;;  %v390_v5 = vld [vmem:[#allocation5 + $0xd0] sm:$0xff]  ;;  %s353_s26 = sadd.s32 1, %s2247_s25  ;;  %s2674_s27 = sld [smem:[#allocation2 + %s2247_s25]]  ;;  %vm497_vm2 = vcmask 56320  }
  0x33   : > { %425 = vmatpush1.msra.mxu0 %v394_v1  ;;  %v389_v6 = vld [vmem:[#allocation5 + $0xc8] sm:$0xff]  ;;  %v388_v7 = vld [vmem:[#allocation5 + $0xc0] sm:$0xff]  ;;  %v387_v8 = vld [vmem:[#allocation5 + $0xb8] sm:$0xff]  ;;  %s2676_s28 = sld [smem:[#allocation2 + %s353_s26]]  ;;  %vm1393_vm3 = vcmask 113664   ;;  %vm1406_vm4 = vcmask 1045504  }
  0x34   : > { %426 = vmatprep.subr.mxu0 %v393_v2  ;;  %v386_v9 = vld [vmem:[#allocation5 + $0xb0] sm:$0xff]  ;;  %v385_v10 = vld [vmem:[#allocation5 + $0xa8] sm:$0xff]  ;;  %v384_v11 = vld [vmem:[#allocation5 + $0xa0] sm:$0xff]  ;;  %p337_p5 = scmp.lt.s32.totalorder %s2634_s10, 1  ;;  %vm2164_vm5 = vcmask 228352   ;;  %vm2168_vm6 = vcmask 224256  }
  0x35   : > { %427 = vmatpush1.msra.mxu0 %v392_v3  ;;  %v383_v12 = vld [vmem:[#allocation5 + $0x98] sm:$0xff]  ;;  %v382_v13 = vld [vmem:[#allocation5 + $0x90] sm:$0xff]  ;;  %v381_v14 = vld [vmem:[#allocation5 + $0x88] sm:$0xff] }
  0x36   : > { %428 = vmatprep.subr.mxu0 %v391_v4  ;;  %v380_v15 = vld [vmem:[#allocation5 + $0x80] sm:$0xff]  ;;  %v379_v16 = vld [vmem:[#allocation5 + $0x78] sm:$0xff]  ;;  %v378_v17 = vld [vmem:[#allocation5 + $0x70] sm:$0xff]  ;;  %s3404_s10 = smov (!%p337_p5, %s2634_s10), 1 }
  0x37   : > { %429 = vmatpush1.msra.mxu0 %v390_v5  ;;  %v377_v18 = vld [vmem:[#allocation5 + $0x68] sm:$0xff]  ;;  %v376_v19 = vld [vmem:[#allocation5 + $0x60] sm:$0xff]  ;;  %v375_v22 = vld [vmem:[#allocation5 + $0x58] sm:$0xff]  ;;  %s2403_s13 = sshll.u32 %s3404_s10, 5 }
  0x38   : > { %430 = vmatprep.subr.mxu0 %v389_v6  ;;  %v348_v20 = vstv %s2674_s27  ;;  %v374_v23 = vld [vmem:[#allocation5 + $0x50] sm:$0xff]  ;;  %v343_v24 = vld [vmem:[%s3386_s2 + $0x8] sm:$0x7f]  ;;  %v2249_v26 = vld [vmem:[%s3385_s1 + $0x18] sm:$0x7f]  ;;  %s341_s16 = scalar_lea.vmem %s3393_s9, %s2403_s13 }
  0x39   : > { %431 = vmatpush1.msra.mxu0 %v388_v7  ;;  %v358_v21 = vstv %s2676_s28  ;;  %v347_v25 = vld [vmem:[%s3385_s1 + $0x8] sm:$0x7f]  ;;  %v372_v30 = vld [vmem:[#allocation5 + $0x40] sm:$0xff]  ;;  %v371_v31 = vld [vmem:[#allocation5 + $0x38] sm:$0xff] }
  0x3a   : > { %432 = vmatprep.subr.mxu0 %v387_v8  ;;  %v373_v27 = vld [vmem:[#allocation5 + $0x48] sm:$0xff]  ;;  %v350_v28 = vmul.f32 %v348_v20, %v347_v25  ;;  %v360_v29 = vmul.f32 %v2249_v26, %v358_v21  ;;  %v370_v33 = vld [vmem:[#allocation5 + $0x30] sm:$0xff]  ;;  %v368_v36 = vld [vmem:[#allocation5 + $0x20] sm:$0xff]  ;;  %v2577_v8 = vmov 0.0  }
  0x3b   : > { %433 = vmatpush1.msra.mxu0 %v386_v9  ;;  %v369_v34 = vld [vmem:[#allocation5 + $0x28] sm:$0xff]  ;;  %v367_v37 = vld [vmem:[#allocation5 + $0x18] sm:$0xff]  ;;  %v366_v38 = vld [vmem:[#allocation5 + $0x10] sm:$0xff]  ;;  %575 = vmatprep.mubr.f32.mxu1 %v2577_v8 }
  0x3c   : > { %434 = vmatprep.subr.mxu0 %v385_v10  ;;  %v352_v32 = vadd.f32 %v350_v28, %v343_v24  ;;  %v365_v39 = vld [vmem:[#allocation5 + $0x8] sm:$0xff]  ;;  %v364_v40 = vld [vmem:[#allocation5] sm:$0xff]  ;;  %v419_v41 = vld [vmem:[#allocation5 + $0x1b8] sm:$0xff] }
  0x3d   : > { %435 = vmatpush1.msra.mxu0 %v384_v11  ;;  %v418_v42 = vld [vmem:[#allocation5 + $0x1b0] sm:$0xff]  ;;  %v417_v43 = vld [vmem:[#allocation5 + $0x1a8] sm:$0xff]  ;;  %v416_v44 = vld [vmem:[#allocation5 + $0x1a0] sm:$0xff] }
  0x3e   : > { %436 = vmatprep.subr.mxu0 %v383_v12  ;;  %v2693_v35 = vadd.f32 %v360_v29, %v352_v32  ;;  %v415_v45 = vld [vmem:[#allocation5 + $0x198] sm:$0xff]  ;;  %v414_v46 = vld [vmem:[#allocation5 + $0x190] sm:$0xff]  ;;  %v413_v47 = vld [vmem:[#allocation5 + $0x188] sm:$0xff] }
  0x3f   : > { %437 = vmatpush1.msra.mxu0 %v382_v13  ;;  %v412_v48 = vld [vmem:[#allocation5 + $0x180] sm:$0xff]  ;;  %v411_v49 = vld [vmem:[#allocation5 + $0x178] sm:$0xff]  ;;  %v410_v50 = vld [vmem:[#allocation5 + $0x170] sm:$0xff] }
  0x40   : > { %438 = vmatprep.subr.mxu0 %v381_v14  ;;  %2250 = vmatprep.mubr.msk.f32.mxu0 %vm420_vm0, %v2693_v35  ;;  %v409_v51 = vld [vmem:[#allocation5 + $0x168] sm:$0xff]  ;;  %v408_v52 = vld [vmem:[#allocation5 + $0x160] sm:$0xff]  ;;  %v407_v53 = vld [vmem:[#allocation5 + $0x158] sm:$0xff] }
  0x41   : > { %439 = vmatpush1.msra.mxu0 %v380_v15  ;;  %v346_v54 = vld [vmem:[%s3385_s1] sm:$0x7f]  ;;  %v406_v55 = vld [vmem:[#allocation5 + $0x150] sm:$0xff]  ;;  %v405_v56 = vld [vmem:[#allocation5 + $0x148] sm:$0xff] }
  0x42   : > { %440 = vmatprep.subr.mxu0 %v379_v16  ;;  %v404_v57 = vld [vmem:[#allocation5 + $0x140] sm:$0xff]  ;;  %v349_v58 = vmul.f32 %v348_v20, %v346_v54  ;;  %v403_v59 = vld [vmem:[#allocation5 + $0x138] sm:$0xff]  ;;  %v2248_v61 = vld [vmem:[%s3385_s1 + $0x10] sm:$0x7f] }
  0x43   : > { %441 = vmatpush1.msra.mxu0 %v378_v17  ;;  %v342_v60 = vld [vmem:[%s3386_s2] sm:$0x7f]  ;;  %v402_v62 = vld [vmem:[#allocation5 + $0x130] sm:$0xff]  ;;  %v401_v63 = vld [vmem:[#allocation5 + $0x128] sm:$0xff]  ;;  %v359_v2 = vmul.f32 %v2248_v61, %v358_v21 }
  0x44   : > { %442 = vmatprep.subr.mxu0 %v377_v18  ;;  %v400_v0 = vld [vmem:[#allocation5 + $0x120] sm:$0xff]  ;;  %v351_v1 = vadd.f32 %v349_v58, %v342_v60  ;;  %v399_v3 = vld [vmem:[#allocation5 + $0x118] sm:$0xff]  ;;  %v398_v4 = vld [vmem:[#allocation5 + $0x110] sm:$0xff] }
  0x45   : > { %443 = vmatpush1.msra.mxu0 %v376_v19  ;;  %v397_v5 = vld [vmem:[#allocation5 + $0x108] sm:$0xff]  ;;  %v396_v6 = vld [vmem:[#allocation5 + $0x100] sm:$0xff]  ;;  %v635_v12 = vld [vmem:[#allocation5 + $0x2b8] sm:$0xff] }
  0x46   : > { %444 = vmatprep.subr.mxu0 %v375_v22  ;;  %v2710_v7 = vadd.f32 %v359_v2, %v351_v1  ;;  %v495_v11 = vld [vmem:[%s3388_s4] sm:$0xff]  ;;  %v634_v13 = vld [vmem:[#allocation5 + $0x2b0] sm:$0xff]  ;;  %v633_v14 = vld [vmem:[#allocation5 + $0x2a8] sm:$0xff] }
  0x47   : > { %445 = vmatpush1.msra.mxu0 %v374_v23  ;;  %v632_v15 = vld [vmem:[#allocation5 + $0x2a0] sm:$0xff]  ;;  %v631_v16 = vld [vmem:[#allocation5 + $0x298] sm:$0xff]  ;;  %v496_v17 = vld [vmem:[%s3388_s4 + $0x8] sm:$0x3f] }
  0x48   : > { %446 = vmatprep.subr.mxu0 %v373_v27  ;;  %v630_v18 = vld [vmem:[#allocation5 + $0x290] sm:$0xff]  ;;  %v629_v19 = vld [vmem:[#allocation5 + $0x288] sm:$0xff]  ;;  %v628_v20 = vld [vmem:[#allocation5 + $0x280] sm:$0xff] }
  0x49   : > { %447 = vmatpush1.msra.mxu0 %v372_v30  ;;  %v627_v21 = vld [vmem:[#allocation5 + $0x278] sm:$0xff]  ;;  %v626_v22 = vld [vmem:[#allocation5 + $0x270] sm:$0xff]  ;;  %v625_v23 = vld [vmem:[#allocation5 + $0x268] sm:$0xff] }
  0x4a   : > { %448 = vmatprep.subr.mxu0 %v371_v31  ;;  %v624_v24 = vld [vmem:[#allocation5 + $0x260] sm:$0xff]  ;;  %v623_v25 = vld [vmem:[#allocation5 + $0x258] sm:$0xff]  ;;  %v622_v26 = vld [vmem:[#allocation5 + $0x250] sm:$0xff] }
  0x4b   : > { %449 = vmatpush1.msra.mxu0 %v370_v33  ;;  %v621_v27 = vld [vmem:[#allocation5 + $0x248] sm:$0xff]  ;;  %v620_v28 = vld [vmem:[#allocation5 + $0x240] sm:$0xff]  ;;  %v619_v29 = vld [vmem:[#allocation5 + $0x238] sm:$0xff] }
  0x4c   : > { %450 = vmatprep.subr.mxu0 %v369_v34  ;;  %v618_v30 = vld [vmem:[#allocation5 + $0x230] sm:$0xff]  ;;  %v617_v31 = vld [vmem:[#allocation5 + $0x228] sm:$0xff]  ;;  %v616_v32 = vld [vmem:[#allocation5 + $0x220] sm:$0xff] }
  0x4d   : > { %451 = vmatpush1.msra.mxu0 %v368_v36  ;;  %v615_v33 = vld [vmem:[#allocation5 + $0x218] sm:$0xff]  ;;  %v614_v34 = vld [vmem:[#allocation5 + $0x210] sm:$0xff]  ;;  %v613_v36 = vld [vmem:[#allocation5 + $0x208] sm:$0xff] }
  0x4e   : > { %452 = vmatprep.subr.mxu0 %v367_v37  ;;  %v612_v37 = vld [vmem:[#allocation5 + $0x200] sm:$0xff]  ;;  %v651_v54 = vld [vmem:[#allocation5 + $0x338] sm:$0xff]  ;;  %v645_v60 = vld [vmem:[#allocation5 + $0x308] sm:$0xff] }
  0x4f   : > { %453 = vmatpush1.msra.mxu0 %v366_v38  ;;  %v611_v38 = vld [vmem:[#allocation5 + $0x1f8] sm:$0xff]  ;;  %v644_v61 = vld [vmem:[#allocation5 + $0x300] sm:$0xff] }
  0x50   : > { %454 = vmatprep.subr.mxu0 %v365_v39  ;;  %v610_v39 = vld [vmem:[#allocation5 + $0x1f0] sm:$0xff]  ;;  %v647_v58 = vld [vmem:[#allocation5 + $0x318] sm:$0xff]  ;;  %v640_v1 = vld [vmem:[#allocation5 + $0x2e0] sm:$0xff] }
  0x51   : > { %455 = vmatpush1.msra.mxu0 %v364_v40  ;;  %v609_v40 = vld [vmem:[#allocation5 + $0x1e8] sm:$0xff]  ;;  %v639_v2 = vld [vmem:[#allocation5 + $0x2d8] sm:$0xff] }
  0x52   : > { %464 = vmatprep.subr.mxu0 %v419_v41  ;;  %v608_v41 = vld [vmem:[#allocation5 + $0x1e0] sm:$0xff] }
  0x53   : > { %465 = vmatpush2.msra.mxu0 %v418_v42  ;;  %v607_v42 = vld [vmem:[#allocation5 + $0x1d8] sm:$0xff] }
  0x54   : > { %466 = vmatprep.subr.mxu0 %v417_v43  ;;  %v606_v43 = vld [vmem:[#allocation5 + $0x1d0] sm:$0xff] }
  0x55   : > { %467 = vmatpush2.msra.mxu0 %v416_v44  ;;  %v605_v44 = vld [vmem:[#allocation5 + $0x1c8] sm:$0xff] }
  0x56   : > { %468 = vmatprep.subr.mxu0 %v415_v45  ;;  %v604_v45 = vld [vmem:[#allocation5 + $0x1c0] sm:$0xff] }
  0x57   : > { %469 = vmatpush2.msra.mxu0 %v414_v46  ;;  %v659_v46 = vld [vmem:[#allocation5 + $0x378] sm:$0xff] }
  0x58   : > { %470 = vmatprep.subr.mxu0 %v413_v47  ;;  %v658_v47 = vld [vmem:[#allocation5 + $0x370] sm:$0xff] }
  0x59   : > { %471 = vmatpush2.msra.mxu0 %v412_v48  ;;  %v657_v48 = vld [vmem:[#allocation5 + $0x368] sm:$0xff] }
  0x5a   : > { %472 = vmatprep.subr.mxu0 %v411_v49  ;;  %v656_v49 = vld [vmem:[#allocation5 + $0x360] sm:$0xff] }
  0x5b   : > { %473 = vmatpush2.msra.mxu0 %v410_v50  ;;  %v655_v50 = vld [vmem:[#allocation5 + $0x358] sm:$0xff] }
  0x5c   : > { %474 = vmatprep.subr.mxu0 %v409_v51  ;;  %v654_v51 = vld [vmem:[#allocation5 + $0x350] sm:$0xff] }
  0x5d   : > { %475 = vmatpush2.msra.mxu0 %v408_v52  ;;  %v653_v52 = vld [vmem:[#allocation5 + $0x348] sm:$0xff] }
  0x5e   : > { %476 = vmatprep.subr.mxu0 %v407_v53  ;;  %v652_v53 = vld [vmem:[#allocation5 + $0x340] sm:$0xff] }
  0x5f   : > { %477 = vmatpush2.msra.mxu0 %v406_v55  ;;  %v650_v55 = vld [vmem:[#allocation5 + $0x330] sm:$0xff] }
  0x60   : > { %478 = vmatprep.subr.mxu0 %v405_v56  ;;  %v649_v56 = vld [vmem:[#allocation5 + $0x328] sm:$0xff] }
  0x61   : > { %479 = vmatpush2.msra.mxu0 %v404_v57  ;;  %v648_v57 = vld [vmem:[#allocation5 + $0x320] sm:$0xff] }
  0x62   : > { %480 = vmatprep.subr.mxu0 %v403_v59  ;;  %v646_v59 = vld [vmem:[#allocation5 + $0x310] sm:$0xff] }
  0x63   : > { %481 = vmatpush2.msra.mxu0 %v402_v62  ;;  %v643_v62 = vld [vmem:[#allocation5 + $0x2f8] sm:$0xff] }
  0x64   : > { %482 = vmatprep.subr.mxu0 %v401_v63  ;;  %v642_v63 = vld [vmem:[#allocation5 + $0x2f0] sm:$0xff] }
  0x65   : > { %483 = vmatpush2.msra.mxu0 %v400_v0  ;;  %v641_v0 = vld [vmem:[#allocation5 + $0x2e8] sm:$0xff] }
  0x66   : > { %484 = vmatprep.subr.mxu0 %v399_v3  ;;  %v638_v3 = vld [vmem:[#allocation5 + $0x2d0] sm:$0xff] }
  0x67   : > { %485 = vmatpush2.msra.mxu0 %v398_v4  ;;  %v637_v4 = vld [vmem:[#allocation5 + $0x2c8] sm:$0xff] }
  0x68   : > { %486 = vmatprep.subr.mxu0 %v397_v5  ;;  %v636_v5 = vld [vmem:[#allocation5 + $0x2c0] sm:$0xff] }
  0x69   : > { %487 = vmatpush2.msra.mxu0 %v396_v6  ;;  %v859_v6 = vld [vmem:[#allocation5 + $0x478] sm:$0xff] }
  0x6a   : > { %489 = vmatmul.mubr.f32.vlgmr.msra.gmra.mxu0 %v2710_v7 }
  0x6b   : > { %810 = vmatprep.mubr.f32.mxu0 %v2577_v8 }
 0x12a   : > { %v490_v9 = vpop.f32.mrf.mxu0 }
 0x12c   : > { %v492_v10 = vpop.f32.mrf.mxu0 }
 0x12d   : > { %2251 = vmatprep.subr.msk.mxu1 %vm504_vm1, %v492_v10  ;;  %v857_v10 = vld [vmem:[#allocation5 + $0x468] sm:$0xff] }
 0x12e   : > { %2252 = vmatpush1.msk.msra.mxu1 %vm504_vm1, %v490_v9  ;;  %v858_v9 = vld [vmem:[#allocation5 + $0x470] sm:$0xff] }
 0x12f   : > { %2253 = vmatmul.mubr.msk.f32.vlgmr.msra.gmra.mxu1 %vm497_vm2, %v495_v11  ;;  %660 = vmatprep.subr.mxu1 %v635_v12  ;;  %v856_v11 = vld [vmem:[#allocation5 + $0x460] sm:$0xff]  ;;  %v855_v12 = vld [vmem:[#allocation5 + $0x458] sm:$0xff] }
 0x130   : > { %661 = vmatpush1.msra.mxu1 %v634_v13  ;;  %581 = vmatprep.mubr.f32.mxu1 %v2577_v8  ;;  %v854_v13 = vld [vmem:[#allocation5 + $0x450] sm:$0xff] }
 0x131   : > { %662 = vmatprep.subr.mxu1 %v633_v14  ;;  %v853_v14 = vld [vmem:[#allocation5 + $0x448] sm:$0xff] }
 0x132   : > { %663 = vmatpush1.msra.mxu1 %v632_v15  ;;  %v852_v15 = vld [vmem:[#allocation5 + $0x440] sm:$0xff] }
 0x133   : > { %664 = vmatprep.subr.mxu1 %v631_v16  ;;  %2254 = vmatmul.mubr.msk.f32.gmra.mxu1 %vm497_vm2, %v496_v17  ;;  %v851_v16 = vld [vmem:[#allocation5 + $0x438] sm:$0xff]  ;;  %v850_v17 = vld [vmem:[#allocation5 + $0x430] sm:$0xff] }
 0x134   : > { %665 = vmatpush1.msra.mxu1 %v630_v18  ;;  %2255 = vmatprep.mubr.msk.f32.mxu1 %vm420_vm0, %v2693_v35  ;;  %v849_v18 = vld [vmem:[#allocation5 + $0x428] sm:$0xff] }
 0x135   : > { %666 = vmatprep.subr.mxu1 %v629_v19  ;;  %v848_v19 = vld [vmem:[#allocation5 + $0x420] sm:$0xff] }
 0x136   : > { %667 = vmatpush1.msra.mxu1 %v628_v20  ;;  %v847_v20 = vld [vmem:[#allocation5 + $0x418] sm:$0xff] }
 0x137   : > { %668 = vmatprep.subr.mxu1 %v627_v21  ;;  %v846_v21 = vld [vmem:[#allocation5 + $0x410] sm:$0xff] }
 0x138   : > { %669 = vmatpush1.msra.mxu1 %v626_v22  ;;  %v845_v22 = vld [vmem:[#allocation5 + $0x408] sm:$0xff] }
 0x139   : > { %670 = vmatprep.subr.mxu1 %v625_v23  ;;  %v844_v23 = vld [vmem:[#allocation5 + $0x400] sm:$0xff] }
 0x13a   : > { %671 = vmatpush1.msra.mxu1 %v624_v24  ;;  %v843_v24 = vld [vmem:[#allocation5 + $0x3f8] sm:$0xff] }
 0x13b   : > { %672 = vmatprep.subr.mxu1 %v623_v25  ;;  %v842_v25 = vld [vmem:[#allocation5 + $0x3f0] sm:$0xff] }
 0x13c   : > { %673 = vmatpush1.msra.mxu1 %v622_v26  ;;  %v841_v26 = vld [vmem:[#allocation5 + $0x3e8] sm:$0xff] }
 0x13d   : > { %674 = vmatprep.subr.mxu1 %v621_v27  ;;  %v840_v27 = vld [vmem:[#allocation5 + $0x3e0] sm:$0xff] }
 0x13e   : > { %675 = vmatpush1.msra.mxu1 %v620_v28  ;;  %v839_v28 = vld [vmem:[#allocation5 + $0x3d8] sm:$0xff] }
 0x13f   : > { %676 = vmatprep.subr.mxu1 %v619_v29  ;;  %v838_v29 = vld [vmem:[#allocation5 + $0x3d0] sm:$0xff] }
 0x140   : > { %677 = vmatpush1.msra.mxu1 %v618_v30  ;;  %v837_v30 = vld [vmem:[#allocation5 + $0x3c8] sm:$0xff] }
 0x141   : > { %678 = vmatprep.subr.mxu1 %v617_v31  ;;  %v836_v31 = vld [vmem:[#allocation5 + $0x3c0] sm:$0xff] }
 0x142   : > { %679 = vmatpush1.msra.mxu1 %v616_v32  ;;  %v835_v32 = vld [vmem:[#allocation5 + $0x3b8] sm:$0xff] }
 0x143   : > { %680 = vmatprep.subr.mxu1 %v615_v33  ;;  %v834_v33 = vld [vmem:[#allocation5 + $0x3b0] sm:$0xff] }
 0x144   : > { %681 = vmatpush1.msra.mxu1 %v614_v34  ;;  %v833_v34 = vld [vmem:[#allocation5 + $0x3a8] sm:$0xff] }
 0x145   : > { %682 = vmatprep.subr.mxu1 %v613_v36  ;;  %v832_v36 = vld [vmem:[#allocation5 + $0x3a0] sm:$0xff] }
 0x146   : > { %683 = vmatpush1.msra.mxu1 %v612_v37  ;;  %v831_v37 = vld [vmem:[#allocation5 + $0x398] sm:$0xff] }
 0x147   : > { %684 = vmatprep.subr.mxu1 %v611_v38  ;;  %v830_v38 = vld [vmem:[#allocation5 + $0x390] sm:$0xff] }
 0x148   : > { %685 = vmatpush1.msra.mxu1 %v610_v39  ;;  %v829_v39 = vld [vmem:[#allocation5 + $0x388] sm:$0xff] }
 0x149   : > { %686 = vmatprep.subr.mxu1 %v609_v40  ;;  %v828_v40 = vld [vmem:[#allocation5 + $0x380] sm:$0xff] }
 0x14a   : > { %687 = vmatpush1.msra.mxu1 %v608_v41  ;;  %v883_v41 = vld [vmem:[#allocation5 + $0x538] sm:$0xff] }
 0x14b   : > { %688 = vmatprep.subr.mxu1 %v607_v42  ;;  %v882_v42 = vld [vmem:[#allocation5 + $0x530] sm:$0xff] }
 0x14c   : > { %689 = vmatpush1.msra.mxu1 %v606_v43  ;;  %v881_v43 = vld [vmem:[#allocation5 + $0x528] sm:$0xff] }
 0x14d   : > { %690 = vmatprep.subr.mxu1 %v605_v44  ;;  %v880_v44 = vld [vmem:[#allocation5 + $0x520] sm:$0xff] }
 0x14e   : > { %691 = vmatpush1.msra.mxu1 %v604_v45  ;;  %v879_v45 = vld [vmem:[#allocation5 + $0x518] sm:$0xff] }
 0x14f   : > { %700 = vmatprep.subr.mxu1 %v659_v46  ;;  %v878_v46 = vld [vmem:[#allocation5 + $0x510] sm:$0xff] }
 0x150   : > { %701 = vmatpush2.msra.mxu1 %v658_v47  ;;  %v877_v47 = vld [vmem:[#allocation5 + $0x508] sm:$0xff] }
 0x151   : > { %702 = vmatprep.subr.mxu1 %v657_v48  ;;  %v876_v48 = vld [vmem:[#allocation5 + $0x500] sm:$0xff] }
 0x152   : > { %703 = vmatpush2.msra.mxu1 %v656_v49  ;;  %v875_v49 = vld [vmem:[#allocation5 + $0x4f8] sm:$0xff] }
 0x153   : > { %704 = vmatprep.subr.mxu1 %v655_v50  ;;  %v874_v50 = vld [vmem:[#allocation5 + $0x4f0] sm:$0xff] }
 0x154   : > { %705 = vmatpush2.msra.mxu1 %v654_v51  ;;  %v873_v51 = vld [vmem:[#allocation5 + $0x4e8] sm:$0xff] }
 0x155   : > { %706 = vmatprep.subr.mxu1 %v653_v52  ;;  %v872_v52 = vld [vmem:[#allocation5 + $0x4e0] sm:$0xff] }
 0x156   : > { %707 = vmatpush2.msra.mxu1 %v652_v53  ;;  %v871_v53 = vld [vmem:[#allocation5 + $0x4d8] sm:$0xff] }
 0x157   : > { %708 = vmatprep.subr.mxu1 %v651_v54  ;;  %v870_v54 = vld [vmem:[#allocation5 + $0x4d0] sm:$0xff] }
 0x158   : > { %709 = vmatpush2.msra.mxu1 %v650_v55  ;;  %v869_v55 = vld [vmem:[#allocation5 + $0x4c8] sm:$0xff] }
 0x159   : > { %710 = vmatprep.subr.mxu1 %v649_v56  ;;  %v868_v56 = vld [vmem:[#allocation5 + $0x4c0] sm:$0xff] }
 0x15a   : > { %711 = vmatpush2.msra.mxu1 %v648_v57  ;;  %v867_v57 = vld [vmem:[#allocation5 + $0x4b8] sm:$0xff] }
 0x15b   : > { %712 = vmatprep.subr.mxu1 %v647_v58  ;;  %v866_v58 = vld [vmem:[#allocation5 + $0x4b0] sm:$0xff] }
 0x15c   : > { %713 = vmatpush2.msra.mxu1 %v646_v59  ;;  %v865_v59 = vld [vmem:[#allocation5 + $0x4a8] sm:$0xff] }
 0x15d   : > { %714 = vmatprep.subr.mxu1 %v645_v60  ;;  %v864_v60 = vld [vmem:[#allocation5 + $0x4a0] sm:$0xff] }
 0x15e   : > { %715 = vmatpush2.msra.mxu1 %v644_v61  ;;  %v863_v61 = vld [vmem:[#allocation5 + $0x498] sm:$0xff] }
 0x15f   : > { %716 = vmatprep.subr.mxu1 %v643_v62  ;;  %v862_v62 = vld [vmem:[#allocation5 + $0x490] sm:$0xff] }
 0x160   : > { %717 = vmatpush2.msra.mxu1 %v642_v63  ;;  %v861_v63 = vld [vmem:[#allocation5 + $0x488] sm:$0xff] }
 0x161   : > { %718 = vmatprep.subr.mxu1 %v641_v0  ;;  %v860_v0 = vld [vmem:[#allocation5 + $0x480] sm:$0xff] }
 0x162   : > { %719 = vmatpush2.msra.mxu1 %v640_v1 }
 0x163   : > { %720 = vmatprep.subr.mxu1 %v639_v2 }
 0x164   : > { %721 = vmatpush2.msra.mxu1 %v638_v3 }
 0x165   : > { %722 = vmatprep.subr.mxu1 %v637_v4 }
 0x166   : > { %723 = vmatpush2.msra.mxu1 %v636_v5 }
 0x167   : > { %725 = vmatmul.mubr.f32.vlgmr.msra.gmra.mxu1 %v2710_v7  ;;  %884 = vmatprep.subr.mxu1 %v859_v6 }
 0x168   : > { %885 = vmatpush1.msra.mxu1 %v858_v9  ;;  %2262 = vmatprep.mubr.msk.f32.mxu1 %vm420_vm0, %v2693_v35  ;;  %v2256_v9 = vld [vmem:[%s3388_s4 + $0x10] sm:$0xff] }
 0x169   : > { %886 = vmatprep.subr.mxu1 %v857_v10  ;;  %v2257_v10 = vld [vmem:[%s3388_s4 + $0x18] sm:$0x3f] }
 0x16a   : > { %887 = vmatpush1.msra.mxu1 %v856_v11 }
 0x16b   : > { %888 = vmatprep.subr.mxu1 %v855_v12 }
 0x16c   : > { %889 = vmatpush1.msra.mxu1 %v854_v13  ;;  %v2263_v13 = vld [vmem:[%s3388_s4 + $0x20] sm:$0xff] }
 0x16d   : > { %890 = vmatprep.subr.mxu1 %v853_v14  ;;  %v1083_v14 = vld [vmem:[#allocation5 + $0x638] sm:$0xff] }
 0x16e   : > { %891 = vmatpush1.msra.mxu1 %v852_v15  ;;  %v1082_v15 = vld [vmem:[#allocation5 + $0x630] sm:$0xff] }
 0x16f   : > { %892 = vmatprep.subr.mxu1 %v851_v16  ;;  %v1081_v16 = vld [vmem:[#allocation5 + $0x628] sm:$0xff] }
 0x170   : > { %893 = vmatpush1.msra.mxu1 %v850_v17  ;;  %v1080_v17 = vld [vmem:[#allocation5 + $0x620] sm:$0xff] }
 0x171   : > { %894 = vmatprep.subr.mxu1 %v849_v18  ;;  %v2264_v18 = vld [vmem:[%s3388_s4 + $0x28] sm:$0x3f] }
 0x172   : > { %895 = vmatpush1.msra.mxu1 %v848_v19  ;;  %v1079_v19 = vld [vmem:[#allocation5 + $0x618] sm:$0xff] }
 0x173   : > { %896 = vmatprep.subr.mxu1 %v847_v20  ;;  %v1078_v20 = vld [vmem:[#allocation5 + $0x610] sm:$0xff] }
 0x174   : > { %897 = vmatpush1.msra.mxu1 %v846_v21  ;;  %v1077_v21 = vld [vmem:[#allocation5 + $0x608] sm:$0xff] }
 0x175   : > { %898 = vmatprep.subr.mxu1 %v845_v22  ;;  %v1076_v22 = vld [vmem:[#allocation5 + $0x600] sm:$0xff] }
 0x176   : > { %899 = vmatpush1.msra.mxu1 %v844_v23  ;;  %v1075_v23 = vld [vmem:[#allocation5 + $0x5f8] sm:$0xff] }
 0x177   : > { %900 = vmatprep.subr.mxu1 %v843_v24  ;;  %v1074_v24 = vld [vmem:[#allocation5 + $0x5f0] sm:$0xff] }
 0x178   : > { %901 = vmatpush1.msra.mxu1 %v842_v25  ;;  %v1073_v25 = vld [vmem:[#allocation5 + $0x5e8] sm:$0xff] }
 0x179   : > { %902 = vmatprep.subr.mxu1 %v841_v26  ;;  %v1072_v26 = vld [vmem:[#allocation5 + $0x5e0] sm:$0xff] }
 0x17a   : > { %903 = vmatpush1.msra.mxu1 %v840_v27  ;;  %v1071_v27 = vld [vmem:[#allocation5 + $0x5d8] sm:$0xff] }
 0x17b   : > { %904 = vmatprep.subr.mxu1 %v839_v28  ;;  %v1070_v28 = vld [vmem:[#allocation5 + $0x5d0] sm:$0xff] }
 0x17c   : > { %905 = vmatpush1.msra.mxu1 %v838_v29  ;;  %v1069_v29 = vld [vmem:[#allocation5 + $0x5c8] sm:$0xff] }
 0x17d   : > { %906 = vmatprep.subr.mxu1 %v837_v30  ;;  %v1068_v30 = vld [vmem:[#allocation5 + $0x5c0] sm:$0xff] }
 0x17e   : > { %907 = vmatpush1.msra.mxu1 %v836_v31  ;;  %v1067_v31 = vld [vmem:[#allocation5 + $0x5b8] sm:$0xff] }
 0x17f   : > { %908 = vmatprep.subr.mxu1 %v835_v32  ;;  %v1066_v32 = vld [vmem:[#allocation5 + $0x5b0] sm:$0xff] }
 0x180   : > { %909 = vmatpush1.msra.mxu1 %v834_v33  ;;  %v1064_v33 = vld [vmem:[#allocation5 + $0x5a0] sm:$0xff] }
 0x181   : > { %910 = vmatprep.subr.mxu1 %v833_v34  ;;  %v1063_v34 = vld [vmem:[#allocation5 + $0x598] sm:$0xff] }
 0x182   : > { %911 = vmatpush1.msra.mxu1 %v832_v36  ;;  %v1062_v36 = vld [vmem:[#allocation5 + $0x590] sm:$0xff] }
 0x183   : > { %912 = vmatprep.subr.mxu1 %v831_v37  ;;  %v1061_v37 = vld [vmem:[#allocation5 + $0x588] sm:$0xff] }
 0x184   : > { %913 = vmatpush1.msra.mxu1 %v830_v38  ;;  %v1060_v38 = vld [vmem:[#allocation5 + $0x580] sm:$0xff] }
 0x185   : > { %914 = vmatprep.subr.mxu1 %v829_v39  ;;  %v1059_v39 = vld [vmem:[#allocation5 + $0x578] sm:$0xff] }
 0x186   : > { %915 = vmatpush1.msra.mxu1 %v828_v40  ;;  %v1058_v40 = vld [vmem:[#allocation5 + $0x570] sm:$0xff] }
 0x187   : > { %924 = vmatprep.subr.mxu1 %v883_v41  ;;  %v1057_v41 = vld [vmem:[#allocation5 + $0x568] sm:$0xff] }
 0x188   : > { %925 = vmatpush2.msra.mxu1 %v882_v42  ;;  %v1056_v42 = vld [vmem:[#allocation5 + $0x560] sm:$0xff] }
 0x189   : > { %926 = vmatprep.subr.mxu1 %v881_v43  ;;  %v1055_v43 = vld [vmem:[#allocation5 + $0x558] sm:$0xff] }
 0x18a   : > { %927 = vmatpush2.msra.mxu1 %v880_v44  ;;  %v1054_v44 = vld [vmem:[#allocation5 + $0x550] sm:$0xff] }
 0x18b   : > { %928 = vmatprep.subr.mxu1 %v879_v45  ;;  %v1053_v45 = vld [vmem:[#allocation5 + $0x548] sm:$0xff] }
 0x18c   : > { %929 = vmatpush2.msra.mxu1 %v878_v46  ;;  %v1052_v46 = vld [vmem:[#allocation5 + $0x540] sm:$0xff] }
 0x18d   : > { %930 = vmatprep.subr.mxu1 %v877_v47  ;;  %v1107_v47 = vld [vmem:[#allocation5 + $0x6f8] sm:$0xff] }
 0x18e   : > { %931 = vmatpush2.msra.mxu1 %v876_v48  ;;  %v1106_v48 = vld [vmem:[#allocation5 + $0x6f0] sm:$0xff] }
 0x18f   : > { %932 = vmatprep.subr.mxu1 %v875_v49  ;;  %v1105_v49 = vld [vmem:[#allocation5 + $0x6e8] sm:$0xff] }
 0x190   : > { %933 = vmatpush2.msra.mxu1 %v874_v50  ;;  %v1104_v50 = vld [vmem:[#allocation5 + $0x6e0] sm:$0xff] }
 0x191   : > { %934 = vmatprep.subr.mxu1 %v873_v51  ;;  %v1103_v51 = vld [vmem:[#allocation5 + $0x6d8] sm:$0xff] }
 0x192   : > { %935 = vmatpush2.msra.mxu1 %v872_v52  ;;  %v1102_v52 = vld [vmem:[#allocation5 + $0x6d0] sm:$0xff] }
 0x193   : > { %936 = vmatprep.subr.mxu1 %v871_v53  ;;  %v1101_v53 = vld [vmem:[#allocation5 + $0x6c8] sm:$0xff] }
 0x194   : > { %937 = vmatpush2.msra.mxu1 %v870_v54  ;;  %v1100_v54 = vld [vmem:[#allocation5 + $0x6c0] sm:$0xff] }
 0x195   : > { %938 = vmatprep.subr.mxu1 %v869_v55  ;;  %v1099_v55 = vld [vmem:[#allocation5 + $0x6b8] sm:$0xff] }
 0x196   : > { %939 = vmatpush2.msra.mxu1 %v868_v56  ;;  %v1098_v56 = vld [vmem:[#allocation5 + $0x6b0] sm:$0xff] }
 0x197   : > { %940 = vmatprep.subr.mxu1 %v867_v57  ;;  %v1097_v57 = vld [vmem:[#allocation5 + $0x6a8] sm:$0xff] }
 0x198   : > { %941 = vmatpush2.msra.mxu1 %v866_v58  ;;  %v1096_v58 = vld [vmem:[#allocation5 + $0x6a0] sm:$0xff] }
 0x199   : > { %942 = vmatprep.subr.mxu1 %v865_v59  ;;  %v1095_v59 = vld [vmem:[#allocation5 + $0x698] sm:$0xff] }
 0x19a   : > { %943 = vmatpush2.msra.mxu1 %v864_v60  ;;  %v1094_v60 = vld [vmem:[#allocation5 + $0x690] sm:$0xff] }
 0x19b   : > { %944 = vmatprep.subr.mxu1 %v863_v61  ;;  %v1093_v61 = vld [vmem:[#allocation5 + $0x688] sm:$0xff] }
 0x19c   : > { %945 = vmatpush2.msra.mxu1 %v862_v62  ;;  %v1092_v62 = vld [vmem:[#allocation5 + $0x680] sm:$0xff] }
 0x19d   : > { %946 = vmatprep.subr.mxu1 %v861_v63  ;;  %v1091_v63 = vld [vmem:[#allocation5 + $0x678] sm:$0xff] }
 0x19e   : > { %947 = vmatpush2.msra.mxu1 %v860_v0  ;;  %v1090_v0 = vld [vmem:[#allocation5 + $0x670] sm:$0xff] }
 0x19f   : > { %949 = vmatmul.mubr.f32.vlgmr.msra.gmra.mxu1 %v2710_v7 }
 0x1a0   : > { %1258 = vmatprep.mubr.f32.mxu1 %v2577_v8 }
 0x1ef   : > { %v2733_v1 = vpop.f32.mrf.mxu1 }
 0x1f1   : > { %v2735_v2 = vpop.f32.mrf.mxu1 }
 0x1f3   : > { %v2737_v3 = vpop.f32.mrf.mxu1 }
 0x1f5   : > { %v2739_v4 = vpop.f32.mrf.mxu1 }
 0x227   : > { %v726_v5 = vpop.f32.mrf.mxu1 }
 0x229   : > { %v728_v6 = vpop.f32.mrf.mxu1 }
 0x22a   : > { %2258 = vmatprep.subr.msk.mxu0 %vm504_vm1, %v728_v6  ;;  %v1088_v6 = vld [vmem:[#allocation5 + $0x660] sm:$0xff] }
 0x22b   : > { %2259 = vmatpush1.msk.msra.mxu0 %vm504_vm1, %v726_v5  ;;  %v1089_v5 = vld [vmem:[#allocation5 + $0x668] sm:$0xff] }
 0x22c   : > { %2260 = vmatmul.mubr.msk.f32.vlgmr.msra.gmra.mxu0 %vm497_vm2, %v2256_v9  ;;  %v1087_v9 = vld [vmem:[#allocation5 + $0x658] sm:$0xff] }
 0x22d   : > { %816 = vmatprep.mubr.f32.mxu0 %v2577_v8 }
 0x230   : > { %2261 = vmatmul.mubr.msk.f32.gmra.mxu0 %vm497_vm2, %v2257_v10  ;;  %v1086_v10 = vld [vmem:[#allocation5 + $0x650] sm:$0xff] }
 0x231   : > { %1034 = vmatprep.mubr.f32.mxu0 %v2577_v8 }
 0x25f   : > { %v950_v11 = vpop.f32.mrf.mxu1 }
 0x261   : > { %v952_v12 = vpop.f32.mrf.mxu1 }
 0x262   : > { %2265 = vmatprep.subr.msk.mxu0 %vm504_vm1, %v952_v12  ;;  %v1084_v12 = vld [vmem:[#allocation5 + $0x640] sm:$0xff] }
 0x263   : > { %2266 = vmatpush1.msk.msra.mxu0 %vm504_vm1, %v950_v11  ;;  %v1085_v11 = vld [vmem:[#allocation5 + $0x648] sm:$0xff] }
 0x264   : > { %2267 = vmatmul.mubr.msk.f32.vlgmr.msra.gmra.mxu0 %vm497_vm2, %v2263_v13  ;;  %1108 = vmatprep.subr.mxu0 %v1083_v14  ;;  %v589_v13 = vlaneseq }
 0x265   : > { %1109 = vmatpush1.msra.mxu0 %v1082_v15  ;;  %1040 = vmatprep.mubr.f32.mxu0 %v2577_v8 }
 0x266   : > { %1110 = vmatprep.subr.mxu0 %v1081_v16  ;;  %v590_v14 = vshrl.u32 %v589_v13, 7  ;;  %v363_v16 = vld [vmem:[%s3389_s5] sm:$0x3] }
 0x267   : > { %1111 = vmatpush1.msra.mxu0 %v1080_v17 }
 0x268   : > { %2268 = vmatmul.mubr.msk.f32.gmra.mxu0 %vm497_vm2, %v2264_v18  ;;  %1112 = vmatprep.subr.mxu0 %v1079_v19  ;;  %v591_v15 = vsub.s32 0, %v590_v14  ;;  %v595_v17 = vsub.s32 1, %v590_v14 }
 0x269   : > { %1113 = vmatpush1.msra.mxu0 %v1078_v20  ;;  %2269 = vmatprep.mubr.msk.f32.mxu0 %vm420_vm0, %v2693_v35  ;;  %v1065_v35 = vld [vmem:[#allocation5 + $0x5a8] sm:$0xff] }
 0x26a   : > { %1114 = vmatprep.subr.mxu0 %v1077_v21  ;;  %v592_v18 = vrot.slane %v363_v16, %v591_v15  ;;  %v596_v19 = vrot.slane %v363_v16, %v595_v17 }
 0x26b   : > { %1115 = vmatpush1.msra.mxu0 %v1076_v22 }
 0x26c   : > { %1116 = vmatprep.subr.mxu0 %v1075_v23  ;;  %v599_v20 = vadd.f32 %v592_v18, %v2733_v1  ;;  %v600_v22 = vadd.f32 %v596_v19, %v2735_v2 }
 0x26d   : > { %1117 = vmatpush1.msra.mxu0 %v1074_v24 }
 0x26e   : > { %1118 = vmatprep.subr.mxu0 %v1073_v25  ;;  %v601_v25 = vadd.f32 %v592_v18, %v2737_v3 }
 0x26f   : > { %1119 = vmatpush1.msra.mxu0 %v1072_v26 }
 0x270   : > { %1120 = vmatprep.subr.mxu0 %v1071_v27  ;;  %v602_v27 = vadd.f32 %v596_v19, %v2739_v4  ;;  %v2270_v4 = vld [vmem:[%s3388_s4 + $0x30] sm:$0xff] }
 0x271   : > { %1121 = vmatpush1.msra.mxu0 %v1070_v28 }
 0x272   : > { %1122 = vmatprep.subr.mxu0 %v1069_v29 }
 0x273   : > { %1123 = vmatpush1.msra.mxu0 %v1068_v30 }
 0x274   : > { %1124 = vmatprep.subr.mxu0 %v1067_v31 }
 0x275   : > { %1125 = vmatpush1.msra.mxu0 %v1066_v32 }
 0x276   : > { %1126 = vmatprep.subr.mxu0 %v1065_v35 }
 0x277   : > { %1127 = vmatpush1.msra.mxu0 %v1064_v33 }
 0x278   : > { %1128 = vmatprep.subr.mxu0 %v1063_v34 }
 0x279   : > { %1129 = vmatpush1.msra.mxu0 %v1062_v36 }
 0x27a   : > { %1130 = vmatprep.subr.mxu0 %v1061_v37 }
 0x27b   : > { %1131 = vmatpush1.msra.mxu0 %v1060_v38  ;;  %v1295_v38 = vld [vmem:[%s3390_s6 + $0x78] sm:$0xff] }
 0x27c   : > { %1132 = vmatprep.subr.mxu0 %v1059_v39  ;;  %v1294_v39 = vld [vmem:[%s3390_s6 + $0x70] sm:$0xff] }
 0x27d   : > { %1133 = vmatpush1.msra.mxu0 %v1058_v40  ;;  %v2271_v40 = vld [vmem:[%s3388_s4 + $0x38] sm:$0x3f] }
 0x27e   : > { %1134 = vmatprep.subr.mxu0 %v1057_v41  ;;  %v1293_v41 = vld [vmem:[%s3390_s6 + $0x68] sm:$0xff] }
 0x27f   : > { %1135 = vmatpush1.msra.mxu0 %v1056_v42  ;;  %v1292_v42 = vld [vmem:[%s3390_s6 + $0x60] sm:$0xff] }
 0x280   : > { %1136 = vmatprep.subr.mxu0 %v1055_v43  ;;  %v1291_v43 = vld [vmem:[%s3390_s6 + $0x58] sm:$0xff] }
 0x281   : > { %1137 = vmatpush1.msra.mxu0 %v1054_v44  ;;  %v1290_v44 = vld [vmem:[%s3390_s6 + $0x50] sm:$0xff] }
 0x282   : > { %1138 = vmatprep.subr.mxu0 %v1053_v45  ;;  %v1289_v45 = vld [vmem:[%s3390_s6 + $0x48] sm:$0xff] }
 0x283   : > { %1139 = vmatpush1.msra.mxu0 %v1052_v46  ;;  %v1288_v46 = vld [vmem:[%s3390_s6 + $0x40] sm:$0xff] }
 0x284   : > { %1148 = vmatprep.subr.mxu0 %v1107_v47  ;;  %v1287_v47 = vld [vmem:[%s3390_s6 + $0x38] sm:$0xff] }
 0x285   : > { %1149 = vmatpush2.msra.mxu0 %v1106_v48  ;;  %v1286_v48 = vld [vmem:[%s3390_s6 + $0x30] sm:$0xff] }
 0x286   : > { %1150 = vmatprep.subr.mxu0 %v1105_v49  ;;  %v1285_v49 = vld [vmem:[%s3390_s6 + $0x28] sm:$0xff] }
 0x287   : > { %1151 = vmatpush2.msra.mxu0 %v1104_v50  ;;  %v1284_v50 = vld [vmem:[%s3390_s6 + $0x20] sm:$0xff] }
 0x288   : > { %1152 = vmatprep.subr.mxu0 %v1103_v51  ;;  %v1283_v51 = vld [vmem:[%s3390_s6 + $0x18] sm:$0xff] }
 0x289   : > { %1153 = vmatpush2.msra.mxu0 %v1102_v52  ;;  %v1282_v52 = vld [vmem:[%s3390_s6 + $0x10] sm:$0xff] }
 0x28a   : > { %1154 = vmatprep.subr.mxu0 %v1101_v53  ;;  %v1281_v53 = vld [vmem:[%s3390_s6 + $0x8] sm:$0xff] }
 0x28b   : > { %1155 = vmatpush2.msra.mxu0 %v1100_v54  ;;  %v1280_v54 = vld [vmem:[%s3390_s6] sm:$0xff] }
 0x28c   : > { %1156 = vmatprep.subr.mxu0 %v1099_v55  ;;  %v1307_v55 = vld [vmem:[%s3390_s6 + $0xd8] sm:$0xff] }
 0x28d   : > { %1157 = vmatpush2.msra.mxu0 %v1098_v56  ;;  %v1306_v56 = vld [vmem:[%s3390_s6 + $0xd0] sm:$0xff] }
 0x28e   : > { %1158 = vmatprep.subr.mxu0 %v1097_v57  ;;  %v1305_v57 = vld [vmem:[%s3390_s6 + $0xc8] sm:$0xff] }
 0x28f   : > { %1159 = vmatpush2.msra.mxu0 %v1096_v58  ;;  %v1304_v58 = vld [vmem:[%s3390_s6 + $0xc0] sm:$0xff] }
 0x290   : > { %1160 = vmatprep.subr.mxu0 %v1095_v59  ;;  %v1303_v59 = vld [vmem:[%s3390_s6 + $0xb8] sm:$0xff] }
 0x291   : > { %1161 = vmatpush2.msra.mxu0 %v1094_v60  ;;  %v1302_v60 = vld [vmem:[%s3390_s6 + $0xb0] sm:$0xff] }
 0x292   : > { %1162 = vmatprep.subr.mxu0 %v1093_v61  ;;  %v1301_v61 = vld [vmem:[%s3390_s6 + $0xa8] sm:$0xff] }
 0x293   : > { %1163 = vmatpush2.msra.mxu0 %v1092_v62  ;;  %v1300_v62 = vld [vmem:[%s3390_s6 + $0xa0] sm:$0xff] }
 0x294   : > { %1164 = vmatprep.subr.mxu0 %v1091_v63  ;;  %v1299_v63 = vld [vmem:[%s3390_s6 + $0x98] sm:$0xff] }
 0x295   : > { %1165 = vmatpush2.msra.mxu0 %v1090_v0  ;;  %v1298_v0 = vld [vmem:[%s3390_s6 + $0x90] sm:$0xff] }
 0x296   : > { %1166 = vmatprep.subr.mxu0 %v1089_v5  ;;  %v1297_v5 = vld [vmem:[%s3390_s6 + $0x88] sm:$0xff] }
 0x297   : > { %1167 = vmatpush2.msra.mxu0 %v1088_v6  ;;  %v1296_v6 = vld [vmem:[%s3390_s6 + $0x80] sm:$0xff] }
 0x298   : > { %1168 = vmatprep.subr.mxu0 %v1087_v9 }
 0x299   : > { %1169 = vmatpush2.msra.mxu0 %v1086_v10 }
 0x29a   : > { %1170 = vmatprep.subr.mxu0 %v1085_v11 }
 0x29b   : > { %1171 = vmatpush2.msra.mxu0 %v1084_v12 }
 0x29c   : > { %1173 = vmatmul.mubr.f32.vlgmr.msra.gmra.mxu0 %v2710_v7 }
 0x2ec   : > { %v812_v21 = vpop.f32.mrf.mxu0 }
 0x2ed   : > { %v823_v23 = vadd.f32 %v812_v21, %v599_v20  ;;  %v1389_v21 = vld [vmem:[%s3391_s7] sm:$0xff] }
 0x2ee   : > { %v814_v24 = vpop.f32.mrf.mxu0  ;;  %2432 = vmatprep.mubr.msk.f32.mxu0 %vm1393_vm3, %v1389_v21  ;;  %v2327_v21 = vld [vmem:[%s3390_s6 + $0x1e0] sm:$0xff] }
 0x2ef   : > { %v824_v7 = vadd.f32 %v814_v24, %v600_v22 }
 0x2f0   : > { %v818_v26 = vpop.f32.mrf.mxu0 }
 0x2f1   : > { %v825_v28 = vadd.f32 %v818_v26, %v601_v25  ;;  %v2299_v26 = vld [vmem:[%s3390_s6 + $0x158] sm:$0xff] }
 0x2f2   : > { %v820_v29 = vpop.f32.mrf.mxu0 }
 0x2f3   : > { %v826_v30 = vadd.f32 %v820_v29, %v602_v27  ;;  %v1391_v27 = vld [vmem:[%s3391_s7 + $0x10] sm:$0xff]  ;;  %v1392_v29 = vld [vmem:[%s3391_s7 + $0x18] sm:$0xf] }
 0x324   : > { %v1036_v31 = vpop.f32.mrf.mxu0 }
 0x325   : > { %v2774_v32 = vadd.f32 %v1036_v31, %v823_v23  ;;  %v2296_v31 = vld [vmem:[%s3390_s6 + $0x140] sm:$0xff] }
 0x326   : > { %v1038_v35 = vpop.f32.mrf.mxu0 }
 0x327   : > { %v2776_v33 = vadd.f32 %v1038_v35, %v824_v7  ;;  %v1390_v7 = vld [vmem:[%s3391_s7 + $0x8] sm:$0xff]  ;;  %v2294_v35 = vld [vmem:[%s3390_s6 + $0x130] sm:$0xff] }
 0x328   : > { %v1042_v1 = vpop.f32.mrf.mxu0 }
 0x329   : > { %v2778_v34 = vadd.f32 %v1042_v1, %v825_v28  ;;  %v2298_v28 = vld [vmem:[%s3390_s6 + $0x150] sm:$0xff]  ;;  %v2292_v1 = vld [vmem:[%s3390_s6 + $0x120] sm:$0xff] }
 0x32a   : > { %v1044_v2 = vpop.f32.mrf.mxu0 }
 0x32b   : > { %v2780_v36 = vadd.f32 %v1044_v2, %v826_v30  ;;  %v2297_v30 = vld [vmem:[%s3390_s6 + $0x148] sm:$0xff]  ;;  %v2290_v2 = vld [vmem:[%s3390_s6 + $0x110] sm:$0xff] }
 0x35c   : > { %v1174_v3 = vpop.f32.mrf.mxu0 }
 0x35e   : > { %v1176_v37 = vpop.f32.mrf.mxu0 }
 0x35f   : > { %2272 = vmatprep.subr.msk.mxu1 %vm504_vm1, %v1176_v37  ;;  %v2287_v37 = vld [vmem:[%s3390_s6 + $0xf8] sm:$0xff] }
 0x360   : > { %2273 = vmatpush1.msk.msra.mxu1 %vm504_vm1, %v1174_v3  ;;  %v2288_v3 = vld [vmem:[%s3390_s6 + $0x100] sm:$0xff] }
 0x361   : > { %2274 = vmatmul.mubr.msk.f32.vlgmr.msra.gmra.mxu1 %vm497_vm2, %v2270_v4  ;;  %1314 = vmatprep.subr.mxu1 %v2577_v8  ;;  %v2286_v4 = vld [vmem:[%s3390_s6 + $0xf0] sm:$0xff] }
 0x362   : > { %1264 = vmatprep.mubr.f32.mxu1 %v2577_v8  ;;  %1315 = vmatpush1.msra.mxu1 %v1295_v38  ;;  %v2285_v38 = vld [vmem:[%s3390_s6 + $0xe8] sm:$0xff] }
 0x363   : > { %1316 = vmatprep.subr.mxu1 %v2577_v8 }
 0x364   : > { %1317 = vmatpush1.msra.mxu1 %v1294_v39  ;;  %v2284_v39 = vld [vmem:[%s3390_s6 + $0xe0] sm:$0xff] }
 0x365   : > { %2275 = vmatmul.mubr.msk.f32.gmra.mxu1 %vm497_vm2, %v2271_v40  ;;  %1318 = vmatprep.subr.mxu1 %v2577_v8  ;;  %v2311_v40 = vld [vmem:[%s3390_s6 + $0x1b8] sm:$0xff] }
 0x366   : > { %1319 = vmatpush1.msra.mxu1 %v1293_v41  ;;  %v2310_v41 = vld [vmem:[%s3390_s6 + $0x1b0] sm:$0xff] }
 0x367   : > { %1320 = vmatprep.subr.mxu1 %v2577_v8 }
 0x368   : > { %1321 = vmatpush1.msra.mxu1 %v1292_v42  ;;  %v2309_v42 = vld [vmem:[%s3390_s6 + $0x1a8] sm:$0xff] }
 0x369   : > { %1322 = vmatprep.subr.mxu1 %v2577_v8 }
 0x36a   : > { %1323 = vmatpush1.msra.mxu1 %v1291_v43  ;;  %v2308_v43 = vld [vmem:[%s3390_s6 + $0x1a0] sm:$0xff] }
 0x36b   : > { %1324 = vmatprep.subr.mxu1 %v2577_v8 }
 0x36c   : > { %1325 = vmatpush1.msra.mxu1 %v1290_v44  ;;  %v2307_v44 = vld [vmem:[%s3390_s6 + $0x198] sm:$0xff] }
 0x36d   : > { %1326 = vmatprep.subr.mxu1 %v2577_v8 }
 0x36e   : > { %1327 = vmatpush1.msra.mxu1 %v1289_v45  ;;  %v2306_v45 = vld [vmem:[%s3390_s6 + $0x190] sm:$0xff] }
 0x36f   : > { %1328 = vmatprep.subr.mxu1 %v2577_v8 }
 0x370   : > { %1329 = vmatpush1.msra.mxu1 %v1288_v46  ;;  %v2305_v46 = vld [vmem:[%s3390_s6 + $0x188] sm:$0xff] }
 0x371   : > { %1330 = vmatprep.subr.mxu1 %v2577_v8 }
 0x372   : > { %1331 = vmatpush1.msra.mxu1 %v1287_v47  ;;  %v2304_v47 = vld [vmem:[%s3390_s6 + $0x180] sm:$0xff] }
 0x373   : > { %1332 = vmatprep.subr.mxu1 %v2577_v8 }
 0x374   : > { %1333 = vmatpush1.msra.mxu1 %v1286_v48  ;;  %v2303_v48 = vld [vmem:[%s3390_s6 + $0x178] sm:$0xff] }
 0x375   : > { %1334 = vmatprep.subr.mxu1 %v2577_v8 }
 0x376   : > { %1335 = vmatpush1.msra.mxu1 %v1285_v49  ;;  %v2302_v49 = vld [vmem:[%s3390_s6 + $0x170] sm:$0xff] }
 0x377   : > { %1336 = vmatprep.subr.mxu1 %v2577_v8 }
 0x378   : > { %1337 = vmatpush1.msra.mxu1 %v1284_v50  ;;  %v2301_v50 = vld [vmem:[%s3390_s6 + $0x168] sm:$0xff] }
 0x379   : > { %1338 = vmatprep.subr.mxu1 %v2577_v8 }
 0x37a   : > { %1339 = vmatpush1.msra.mxu1 %v1283_v51  ;;  %v2300_v51 = vld [vmem:[%s3390_s6 + $0x160] sm:$0xff] }
 0x37b   : > { %1340 = vmatprep.subr.mxu1 %v2577_v8 }
 0x37c   : > { %1341 = vmatpush1.msra.mxu1 %v1282_v52  ;;  %v2314_v52 = vld [vmem:[%s3391_s7 + $0x20] sm:$0xff] }
 0x37d   : > { %1342 = vmatprep.subr.mxu1 %v2577_v8 }
 0x37e   : > { %1343 = vmatpush1.msra.mxu1 %v1281_v53 }
 0x37f   : > { %1344 = vmatprep.subr.mxu1 %v2577_v8 }
 0x380   : > { %1345 = vmatpush1.msra.mxu1 %v1280_v54 }
 0x381   : > { %1354 = vmatprep.subr.mxu1 %v2577_v8 }
 0x382   : > { %1355 = vmatpush2.msra.mxu1 %v1307_v55 }
 0x383   : > { %1356 = vmatprep.subr.mxu1 %v2577_v8 }
 0x384   : > { %1357 = vmatpush2.msra.mxu1 %v1306_v56 }
 0x385   : > { %1358 = vmatprep.subr.mxu1 %v2577_v8 }
 0x386   : > { %1359 = vmatpush2.msra.mxu1 %v1305_v57 }
 0x387   : > { %1360 = vmatprep.subr.mxu1 %v2577_v8 }
 0x388   : > { %1361 = vmatpush2.msra.mxu1 %v1304_v58 }
 0x389   : > { %1362 = vmatprep.subr.mxu1 %v2577_v8 }
 0x38a   : > { %1363 = vmatpush2.msra.mxu1 %v1303_v59 }
 0x38b   : > { %1364 = vmatprep.subr.mxu1 %v2577_v8 }
 0x38c   : > { %1365 = vmatpush2.msra.mxu1 %v1302_v60 }
 0x38d   : > { %1366 = vmatprep.subr.mxu1 %v2577_v8 }
 0x38e   : > { %1367 = vmatpush2.msra.mxu1 %v1301_v61  ;;  %v2315_v61 = vld [vmem:[%s3391_s7 + $0x28] sm:$0xff] }
 0x38f   : > { %1368 = vmatprep.subr.mxu1 %v2577_v8 }
 0x390   : > { %1369 = vmatpush2.msra.mxu1 %v1300_v62  ;;  %v2338_v62 = vld [vmem:[%s3390_s6 + $0x238] sm:$0xff] }
 0x391   : > { %1370 = vmatprep.subr.mxu1 %v2577_v8 }
 0x392   : > { %1371 = vmatpush2.msra.mxu1 %v1299_v63  ;;  %v2316_v63 = vld [vmem:[%s3391_s7 + $0x30] sm:$0xff] }
 0x393   : > { %1372 = vmatprep.subr.mxu1 %v2577_v8 }
 0x394   : > { %1373 = vmatpush2.msra.mxu1 %v1298_v0  ;;  %v2337_v0 = vld [vmem:[%s3390_s6 + $0x230] sm:$0xff] }
 0x395   : > { %1374 = vmatprep.subr.mxu1 %v2577_v8 }
 0x396   : > { %1375 = vmatpush2.msra.mxu1 %v1297_v5  ;;  %v2317_v5 = vld [vmem:[%s3391_s7 + $0x38] sm:$0xf] }
 0x397   : > { %1376 = vmatprep.subr.mxu1 %v2577_v8 }
 0x398   : > { %1377 = vmatpush2.msra.mxu1 %v1296_v6  ;;  %v2336_v6 = vld [vmem:[%s3390_s6 + $0x228] sm:$0xff] }
 0x421   : > { %v1260_v9 = vpop.f32.mrf.mxu1 }
 0x422   : > { %v1271_v10 = vadd.f32 %v1260_v9, %v2774_v32  ;;  %v2295_v32 = vld [vmem:[%s3390_s6 + $0x138] sm:$0xff]  ;;  %v2335_v9 = vld [vmem:[%s3390_s6 + $0x220] sm:$0xff] }
 0x423   : > { %v1262_v11 = vpop.f32.mrf.mxu1 }
 0x424   : > { %v1272_v12 = vadd.f32 %v1262_v11, %v2776_v33  ;;  %v2909_v15 = vmax.f32 %v1271_v10, 0.0  ;;  %v2293_v33 = vld [vmem:[%s3390_s6 + $0x128] sm:$0xff]  ;;  %v2334_v10 = vld [vmem:[%s3390_s6 + $0x218] sm:$0xff]  ;;  %v2333_v11 = vld [vmem:[%s3390_s6 + $0x210] sm:$0xff] }
 0x425   : > { %v1266_v13 = vpop.f32.mrf.mxu1 }
 0x426   : > { %v2907_v14 = vmax.f32 %v1272_v12, 0.0  ;;  %v1273_v16 = vadd.f32 %v1266_v13, %v2778_v34  ;;  %v2291_v34 = vld [vmem:[%s3390_s6 + $0x118] sm:$0xff]  ;;  %v2332_v12 = vld [vmem:[%s3390_s6 + $0x208] sm:$0xff]  ;;  %v2331_v13 = vld [vmem:[%s3390_s6 + $0x200] sm:$0xff] }
 0x427   : > { %v1268_v17 = vpop.f32.mrf.mxu1 }
 0x428   : > { %v1274_v18 = vadd.f32 %v1268_v17, %v2780_v36  ;;  %2276 = vmatprep.mubr.msk.f32.mxu1 %vm420_vm0, %v2907_v14  ;;  %v2918_v20 = vmax.f32 %v1273_v16, 0.0  ;;  %v2289_v36 = vld [vmem:[%s3390_s6 + $0x108] sm:$0xff]  ;;  %v2330_v16 = vld [vmem:[%s3390_s6 + $0x1f8] sm:$0xff]  ;;  %v2329_v17 = vld [vmem:[%s3390_s6 + $0x1f0] sm:$0xff] }
 0x429   : > { %1379 = vmatmul.mubr.f32.vlgmr.msra.gmra.mxu1 %v2909_v15 }
 0x42a   : > { %v2916_v19 = vmax.f32 %v1274_v18, 0.0  ;;  %v2328_v18 = vld [vmem:[%s3390_s6 + $0x1e8] sm:$0xff] }
 0x42c   : > { %2277 = vmatprep.mubr.msk.f32.mxu1 %vm420_vm0, %v2916_v19 }
 0x42d   : > { %1384 = vmatmul.mubr.f32.gmra.mxu1 %v2918_v20 }
 0x42e   : > { %2442 = vmatprep.mubr.msk.f32.mxu1 %vm1393_vm3, %v2314_v52  ;;  %v2377_v52 = vld [vmem:[%s3390_s6 + $0x318] sm:$0xff] }
 0x4e9   : > { %v1380_v22 = vpop.f32.mrf.mxu1 }
 0x4eb   : > { %v1382_v23 = vpop.f32.mrf.mxu1 }
 0x4ec   : > { %v2325_v23 = vld [vmem:[%s3390_s6 + $0x1d0] sm:$0xff] }
 0x4ed   : > { %v1385_v24 = vpop.f32.mrf.mxu1 }
 0x4ee   : > { %2428 = vmatprep.subr.msk.mxu0 %vm1406_vm4, %v1385_v24 }
 0x4ef   : > { %v1387_v25 = vpop.f32.mrf.mxu1  ;;  %2429 = vmatpush3.msk.msra.mxu0 %vm1406_vm4, %v1385_v24  ;;  %v2324_v24 = vld [vmem:[%s3390_s6 + $0x1c8] sm:$0xff] }
 0x4f0   : > { %2430 = vmatprep.subr.mxu0 %v1380_v22  ;;  %v2323_v25 = vld [vmem:[%s3390_s6 + $0x1c0] sm:$0xff] }
 0x4f1   : > { %2431 = vmatpush3.msra.mxu0 %v1380_v22  ;;  %v2326_v22 = vld [vmem:[%s3390_s6 + $0x1d8] sm:$0xff] }
 0x4f2   : > { %2433 = vmatmul.mubr.msk.f32.vlgmr.msra.gmra.mxu0 %vm1393_vm3, %v1390_v7  ;;  %1534 = vmatprep.subr.mxu0 %v2577_v8  ;;  %v2350_v7 = vld [vmem:[%s3390_s6 + $0x298] sm:$0xff] }
 0x4f3   : > { %1535 = vmatpush1.msra.mxu0 %v2299_v26  ;;  %2435 = vmatprep.mubr.msk.f32.mxu0 %vm1393_vm3, %v1391_v27  ;;  %v2349_v26 = vld [vmem:[%s3390_s6 + $0x290] sm:$0xff]  ;;  %v2348_v27 = vld [vmem:[%s3390_s6 + $0x288] sm:$0xff] }
 0x4f4   : > { %1536 = vmatprep.subr.mxu0 %v2577_v8 }
 0x4f5   : > { %1537 = vmatpush1.msra.mxu0 %v2298_v28  ;;  %v2347_v28 = vld [vmem:[%s3390_s6 + $0x280] sm:$0xff] }
 0x4f6   : > { %2436 = vmatmul.mubr.msk.f32.gmra.mxu0 %vm1393_vm3, %v1392_v29  ;;  %1538 = vmatprep.subr.mxu0 %v2577_v8  ;;  %v2346_v29 = vld [vmem:[%s3390_s6 + $0x278] sm:$0xff] }
 0x4f7   : > { %1539 = vmatpush1.msra.mxu0 %v2297_v30  ;;  %2312 = vmatprep.mubr.msk.f32.mxu0 %vm420_vm0, %v2907_v14  ;;  %v2345_v30 = vld [vmem:[%s3390_s6 + $0x270] sm:$0xff] }
 0x4f8   : > { %1540 = vmatprep.subr.mxu0 %v2577_v8 }
 0x4f9   : > { %1541 = vmatpush1.msra.mxu0 %v2296_v31  ;;  %v2344_v31 = vld [vmem:[%s3390_s6 + $0x268] sm:$0xff] }
 0x4fa   : > { %1542 = vmatprep.subr.mxu0 %v2577_v8 }
 0x4fb   : > { %1543 = vmatpush1.msra.mxu0 %v2295_v32  ;;  %v2343_v32 = vld [vmem:[%s3390_s6 + $0x260] sm:$0xff] }
 0x4fc   : > { %1544 = vmatprep.subr.mxu0 %v2577_v8 }
 0x4fd   : > { %1545 = vmatpush1.msra.mxu0 %v2294_v35  ;;  %v2342_v35 = vld [vmem:[%s3390_s6 + $0x258] sm:$0xff] }
 0x4fe   : > { %1546 = vmatprep.subr.mxu0 %v2577_v8 }
 0x4ff   : > { %1547 = vmatpush1.msra.mxu0 %v2293_v33  ;;  %v2341_v33 = vld [vmem:[%s3390_s6 + $0x250] sm:$0xff] }
 0x500   : > { %1548 = vmatprep.subr.mxu0 %v2577_v8 }
 0x501   : > { %1549 = vmatpush1.msra.mxu0 %v2292_v1  ;;  %v2340_v1 = vld [vmem:[%s3390_s6 + $0x248] sm:$0xff] }
 0x502   : > { %1550 = vmatprep.subr.mxu0 %v2577_v8 }
 0x503   : > { %1551 = vmatpush1.msra.mxu0 %v2291_v34  ;;  %v2339_v34 = vld [vmem:[%s3390_s6 + $0x240] sm:$0xff] }
 0x504   : > { %1552 = vmatprep.subr.mxu0 %v2577_v8 }
 0x505   : > { %1553 = vmatpush1.msra.mxu0 %v2290_v2  ;;  %v2353_v2 = vld [vmem:[%s3391_s7 + $0x40] sm:$0xff] }
 0x506   : > { %1554 = vmatprep.subr.mxu0 %v2577_v8 }
 0x507   : > { %1555 = vmatpush1.msra.mxu0 %v2289_v36  ;;  %v2283_v36 = vld [vmem:[%s3392_s8] ss:$0 sm:$0xff] }
 0x508   : > { %1556 = vmatprep.subr.mxu0 %v2577_v8 }
 0x509   : > { %1557 = vmatpush1.msra.mxu0 %v2288_v3 }
 0x50a   : > { %1558 = vmatprep.subr.mxu0 %v2577_v8 }
 0x50b   : > { %1559 = vmatpush1.msra.mxu0 %v2287_v37 }
 0x50c   : > { %1560 = vmatprep.subr.mxu0 %v2577_v8 }
 0x50d   : > { %1561 = vmatpush1.msra.mxu0 %v2286_v4 }
 0x50e   : > { %1562 = vmatprep.subr.mxu0 %v2577_v8 }
 0x50f   : > { %1563 = vmatpush1.msra.mxu0 %v2285_v38 }
 0x510   : > { %1564 = vmatprep.subr.mxu0 %v2577_v8 }
 0x511   : > { %1565 = vmatpush1.msra.mxu0 %v2284_v39 }
 0x512   : > { %1574 = vmatprep.subr.mxu0 %v2577_v8 }
 0x513   : > { %1575 = vmatpush2.msra.mxu0 %v2311_v40 }
 0x514   : > { %1576 = vmatprep.subr.mxu0 %v2577_v8 }
 0x515   : > { %1577 = vmatpush2.msra.mxu0 %v2310_v41 }
 0x516   : > { %1578 = vmatprep.subr.mxu0 %v2577_v8 }
 0x517   : > { %1579 = vmatpush2.msra.mxu0 %v2309_v42 }
 0x518   : > { %1580 = vmatprep.subr.mxu0 %v2577_v8 }
 0x519   : > { %1581 = vmatpush2.msra.mxu0 %v2308_v43 }
 0x51a   : > { %1582 = vmatprep.subr.mxu0 %v2577_v8 }
 0x51b   : > { %1583 = vmatpush2.msra.mxu0 %v2307_v44 }
 0x51c   : > { %1584 = vmatprep.subr.mxu0 %v2577_v8 }
 0x51d   : > { %1585 = vmatpush2.msra.mxu0 %v2306_v45 }
 0x51e   : > { %1586 = vmatprep.subr.mxu0 %v2577_v8 }
 0x51f   : > { %1587 = vmatpush2.msra.mxu0 %v2305_v46 }
 0x520   : > { %1588 = vmatprep.subr.mxu0 %v2577_v8 }
 0x521   : > { %1589 = vmatpush2.msra.mxu0 %v2304_v47 }
 0x522   : > { %1590 = vmatprep.subr.mxu0 %v2577_v8 }
 0x523   : > { %1591 = vmatpush2.msra.mxu0 %v2303_v48 }
 0x524   : > { %1592 = vmatprep.subr.mxu0 %v2577_v8 }
 0x525   : > { %1593 = vmatpush2.msra.mxu0 %v2302_v49 }
 0x526   : > { %1594 = vmatprep.subr.mxu0 %v2577_v8 }
 0x527   : > { %1595 = vmatpush2.msra.mxu0 %v2301_v50 }
 0x528   : > { %1596 = vmatprep.subr.mxu0 %v2577_v8 }
 0x529   : > { %1597 = vmatpush2.msra.mxu0 %v2300_v51  ;;  %v2354_v51 = vld [vmem:[%s3391_s7 + $0x48] sm:$0xff] }
 0x52a   : > { %1599 = vmatmul.mubr.f32.vlgmr.msra.gmra.mxu0 %v2909_v15 }
 0x52b   : > { %2313 = vmatprep.mubr.msk.f32.mxu0 %vm420_vm0, %v2916_v19 }
 0x52e   : > { %1604 = vmatmul.mubr.f32.gmra.mxu0 %v2918_v20 }
 0x52f   : > { %2452 = vmatprep.mubr.msk.f32.mxu0 %vm1393_vm3, %v2353_v2  ;;  %v2395_v2 = vld [vmem:[%s3391_s7 + $0x78] sm:$0xf] }
 0x5b2   : > { %v3063_v53 = vpop.f32.mrf.mxu0 }
 0x5b3   : > { %v1502_v3 = vadd.f32 %v3063_v53, %v2283_v36  ;;  %v2355_v53 = vld [vmem:[%s3391_s7 + $0x50] sm:$0xff] }
 0x5b4   : > { %v3065_v54 = vpop.f32.mrf.mxu0 }
 0x5b5   : > { %v1501_v4 = vadd.f32 %v2283_v36, %v3065_v54  ;;  %v2376_v54 = vld [vmem:[%s3390_s6 + $0x310] sm:$0xff] }
 0x5b6   : > { %v3067_v55 = vpop.f32.mrf.mxu0 }
 0x5b7   : > { %v1504_v40 = vadd.f32 %v3067_v55, %v2283_v36  ;;  %v2356_v55 = vld [vmem:[%s3391_s7 + $0x58] sm:$0xf] }
 0x5b8   : > { %v3069_v56 = vpop.f32.mrf.mxu0 }
 0x5b9   : > { %v1503_v43 = vadd.f32 %v2283_v36, %v3069_v56  ;;  %v2375_v56 = vld [vmem:[%s3390_s6 + $0x308] sm:$0xff] }
 0x5ea   : > { %v1600_v57 = vpop.f32.mrf.mxu0 }
 0x5ec   : > { %v1602_v58 = vpop.f32.mrf.mxu0 }
 0x5ed   : > { %v2373_v58 = vld [vmem:[%s3390_s6 + $0x2f8] sm:$0xff] }
 0x5ee   : > { %v1605_v59 = vpop.f32.mrf.mxu0 }
 0x5ef   : > { %2438 = vmatprep.subr.msk.mxu1 %vm1406_vm4, %v1605_v59 }
 0x5f0   : > { %v1607_v60 = vpop.f32.mrf.mxu0  ;;  %2439 = vmatpush3.msk.msra.mxu1 %vm1406_vm4, %v1605_v59  ;;  %v2372_v59 = vld [vmem:[%s3390_s6 + $0x2f0] sm:$0xff] }
 0x5f1   : > { %2440 = vmatprep.subr.mxu1 %v1600_v57  ;;  %v2370_v60 = vld [vmem:[%s3390_s6 + $0x2e0] sm:$0xff] }
 0x5f2   : > { %2441 = vmatpush3.msra.mxu1 %v1600_v57  ;;  %v2374_v57 = vld [vmem:[%s3390_s6 + $0x300] sm:$0xff] }
 0x5f3   : > { %2443 = vmatmul.mubr.msk.f32.vlgmr.msra.gmra.mxu1 %vm1393_vm3, %v2315_v61  ;;  %1747 = vmatprep.subr.mxu1 %v2577_v8  ;;  %v2369_v61 = vld [vmem:[%s3390_s6 + $0x2d8] sm:$0xff] }
 0x5f4   : > { %1748 = vmatpush1.msra.mxu1 %v2338_v62  ;;  %2445 = vmatprep.mubr.msk.f32.mxu1 %vm1393_vm3, %v2316_v63  ;;  %v2368_v62 = vld [vmem:[%s3390_s6 + $0x2d0] sm:$0xff]  ;;  %v2367_v63 = vld [vmem:[%s3390_s6 + $0x2c8] sm:$0xff] }
 0x5f5   : > { %1749 = vmatprep.subr.mxu1 %v2577_v8 }
 0x5f6   : > { %1750 = vmatpush1.msra.mxu1 %v2337_v0  ;;  %v2366_v0 = vld [vmem:[%s3390_s6 + $0x2c0] sm:$0xff] }
 0x5f7   : > { %2446 = vmatmul.mubr.msk.f32.gmra.mxu1 %vm1393_vm3, %v2317_v5  ;;  %1751 = vmatprep.subr.mxu1 %v2577_v8  ;;  %v2365_v5 = vld [vmem:[%s3390_s6 + $0x2b8] sm:$0xff] }
 0x5f8   : > { %1752 = vmatpush1.msra.mxu1 %v2336_v6  ;;  %2351 = vmatprep.mubr.msk.f32.mxu1 %vm420_vm0, %v2907_v14  ;;  %v2364_v6 = vld [vmem:[%s3390_s6 + $0x2b0] sm:$0xff] }
 0x5f9   : > { %1753 = vmatprep.subr.mxu1 %v2577_v8 }
 0x5fa   : > { %1754 = vmatpush1.msra.mxu1 %v2335_v9  ;;  %v2363_v9 = vld [vmem:[%s3390_s6 + $0x2a8] sm:$0xff] }
 0x5fb   : > { %1755 = vmatprep.subr.mxu1 %v2577_v8 }
 0x5fc   : > { %1756 = vmatpush1.msra.mxu1 %v2334_v10  ;;  %v2362_v10 = vld [vmem:[%s3390_s6 + $0x2a0] sm:$0xff] }
 0x5fd   : > { %1757 = vmatprep.subr.mxu1 %v2577_v8 }
 0x5fe   : > { %1758 = vmatpush1.msra.mxu1 %v2333_v11  ;;  %v2389_v11 = vld [vmem:[%s3390_s6 + $0x378] sm:$0xff] }
 0x5ff   : > { %1759 = vmatprep.subr.mxu1 %v2577_v8 }
 0x600   : > { %1760 = vmatpush1.msra.mxu1 %v2332_v12  ;;  %v2388_v12 = vld [vmem:[%s3390_s6 + $0x370] sm:$0xff] }
 0x601   : > { %1761 = vmatprep.subr.mxu1 %v2577_v8 }
 0x602   : > { %1762 = vmatpush1.msra.mxu1 %v2331_v13  ;;  %v2387_v13 = vld [vmem:[%s3390_s6 + $0x368] sm:$0xff] }
 0x603   : > { %1763 = vmatprep.subr.mxu1 %v2577_v8 }
 0x604   : > { %1764 = vmatpush1.msra.mxu1 %v2330_v16  ;;  %v2386_v16 = vld [vmem:[%s3390_s6 + $0x360] sm:$0xff] }
 0x605   : > { %1765 = vmatprep.subr.mxu1 %v2577_v8 }
 0x606   : > { %1766 = vmatpush1.msra.mxu1 %v2329_v17  ;;  %v2385_v17 = vld [vmem:[%s3390_s6 + $0x358] sm:$0xff] }
 0x607   : > { %1767 = vmatprep.subr.mxu1 %v2577_v8 }
 0x608   : > { %1768 = vmatpush1.msra.mxu1 %v2328_v18  ;;  %v2384_v18 = vld [vmem:[%s3390_s6 + $0x350] sm:$0xff] }
 0x609   : > { %1769 = vmatprep.subr.mxu1 %v2577_v8 }
 0x60a   : > { %1770 = vmatpush1.msra.mxu1 %v2327_v21  ;;  %v2383_v21 = vld [vmem:[%s3390_s6 + $0x348] sm:$0xff] }
 0x60b   : > { %1771 = vmatprep.subr.mxu1 %v2577_v8 }
 0x60c   : > { %1772 = vmatpush1.msra.mxu1 %v2326_v22  ;;  %v2382_v22 = vld [vmem:[%s3390_s6 + $0x340] sm:$0xff] }
 0x60d   : > { %1773 = vmatprep.subr.mxu1 %v2577_v8 }
 0x60e   : > { %1774 = vmatpush1.msra.mxu1 %v2325_v23  ;;  %v2381_v23 = vld [vmem:[%s3390_s6 + $0x338] sm:$0xff] }
 0x60f   : > { %1775 = vmatprep.subr.mxu1 %v2577_v8 }
 0x610   : > { %1776 = vmatpush1.msra.mxu1 %v2324_v24  ;;  %v2380_v24 = vld [vmem:[%s3390_s6 + $0x330] sm:$0xff] }
 0x611   : > { %1777 = vmatprep.subr.mxu1 %v2577_v8 }
 0x612   : > { %1778 = vmatpush1.msra.mxu1 %v2323_v25  ;;  %v2379_v25 = vld [vmem:[%s3390_s6 + $0x328] sm:$0xff] }
 0x613   : > { %1787 = vmatprep.subr.mxu1 %v2577_v8 }
 0x614   : > { %1788 = vmatpush2.msra.mxu1 %v2350_v7  ;;  %v2378_v7 = vld [vmem:[%s3390_s6 + $0x320] sm:$0xff] }
 0x615   : > { %1789 = vmatprep.subr.mxu1 %v2577_v8 }
 0x616   : > { %1790 = vmatpush2.msra.mxu1 %v2349_v26  ;;  %v2392_v26 = vld [vmem:[%s3391_s7 + $0x60] sm:$0xff] }
 0x617   : > { %1791 = vmatprep.subr.mxu1 %v2577_v8 }
 0x618   : > { %1792 = vmatpush2.msra.mxu1 %v2348_v27 }
 0x619   : > { %1793 = vmatprep.subr.mxu1 %v2577_v8 }
 0x61a   : > { %1794 = vmatpush2.msra.mxu1 %v2347_v28 }
 0x61b   : > { %1795 = vmatprep.subr.mxu1 %v2577_v8 }
 0x61c   : > { %1796 = vmatpush2.msra.mxu1 %v2346_v29 }
 0x61d   : > { %1797 = vmatprep.subr.mxu1 %v2577_v8 }
 0x61e   : > { %1798 = vmatpush2.msra.mxu1 %v2345_v30 }
 0x61f   : > { %1799 = vmatprep.subr.mxu1 %v2577_v8 }
 0x620   : > { %1800 = vmatpush2.msra.mxu1 %v2344_v31 }
 0x621   : > { %1801 = vmatprep.subr.mxu1 %v2577_v8 }
 0x622   : > { %1802 = vmatpush2.msra.mxu1 %v2343_v32 }
 0x623   : > { %1803 = vmatprep.subr.mxu1 %v2577_v8 }
 0x624   : > { %1804 = vmatpush2.msra.mxu1 %v2342_v35 }
 0x625   : > { %1805 = vmatprep.subr.mxu1 %v2577_v8 }
 0x626   : > { %1806 = vmatpush2.msra.mxu1 %v2341_v33 }
 0x627   : > { %1807 = vmatprep.subr.mxu1 %v2577_v8 }
 0x628   : > { %1808 = vmatpush2.msra.mxu1 %v2340_v1  ;;  %v2393_v1 = vld [vmem:[%s3391_s7 + $0x68] sm:$0xff] }
 0x629   : > { %1809 = vmatprep.subr.mxu1 %v2577_v8 }
 0x62a   : > { %1810 = vmatpush2.msra.mxu1 %v2339_v34  ;;  %v2394_v34 = vld [vmem:[%s3391_s7 + $0x70] sm:$0xff] }
 0x62b   : > { %1812 = vmatmul.mubr.f32.vlgmr.msra.gmra.mxu1 %v2909_v15 }
 0x62c   : > { %2352 = vmatprep.mubr.msk.f32.mxu1 %vm420_vm0, %v2916_v19 }
 0x62f   : > { %1817 = vmatmul.mubr.f32.gmra.mxu1 %v2918_v20 }
 0x630   : > { %2462 = vmatprep.mubr.msk.f32.mxu1 %vm1393_vm3, %v2392_v26 }
 0x6b3   : > { %v2444_v37 = vpop.f32.mrf.mxu1 }
 0x6b4   : > { %v3212_v38 = vadd.f32 %v2444_v37, %v1502_v3 }
 0x6b5   : > { %v1695_v39 = vpop.f32.mrf.mxu1 }
 0x6b6   : > { %v3215_v41 = vadd.f32 %v1695_v39, %v1501_v4 }
 0x6b7   : > { %v2447_v42 = vpop.f32.mrf.mxu1 }
 0x6b8   : > { %v3218_v44 = vadd.f32 %v2447_v42, %v1504_v40 }
 0x6b9   : > { %v1705_v45 = vpop.f32.mrf.mxu1 }
 0x6ba   : > { %v3220_v46 = vadd.f32 %v1705_v45, %v1503_v43 }
 0x6eb   : > { %v1813_v47 = vpop.f32.mrf.mxu1 }
 0x6ed   : > { %v1815_v48 = vpop.f32.mrf.mxu1 }
 0x6ef   : > { %v1818_v49 = vpop.f32.mrf.mxu1 }
 0x6f0   : > { %2448 = vmatprep.subr.msk.mxu0 %vm1406_vm4, %v1818_v49 }
 0x6f1   : > { %v1820_v50 = vpop.f32.mrf.mxu1  ;;  %2449 = vmatpush3.msk.msra.mxu0 %vm1406_vm4, %v1818_v49 }
 0x6f2   : > { %2450 = vmatprep.subr.mxu0 %v1813_v47 }
 0x6f3   : > { %2451 = vmatpush3.msra.mxu0 %v1813_v47 }
 0x6f4   : > { %2453 = vmatmul.mubr.msk.f32.vlgmr.msra.gmra.mxu0 %vm1393_vm3, %v2354_v51  ;;  %1960 = vmatprep.subr.mxu0 %v2577_v8 }
 0x6f5   : > { %1961 = vmatpush1.msra.mxu0 %v2377_v52  ;;  %2455 = vmatprep.mubr.msk.f32.mxu0 %vm1393_vm3, %v2355_v53 }
 0x6f6   : > { %1962 = vmatprep.subr.mxu0 %v2577_v8 }
 0x6f7   : > { %1963 = vmatpush1.msra.mxu0 %v2376_v54 }
 0x6f8   : > { %2456 = vmatmul.mubr.msk.f32.gmra.mxu0 %vm1393_vm3, %v2356_v55  ;;  %1964 = vmatprep.subr.mxu0 %v2577_v8 }
 0x6f9   : > { %1965 = vmatpush1.msra.mxu0 %v2375_v56  ;;  %2390 = vmatprep.mubr.msk.f32.mxu0 %vm420_vm0, %v2907_v14  ;;  %v2371_v14 = vld [vmem:[%s3390_s6 + $0x2e8] sm:$0xff] }
 0x6fa   : > { %1966 = vmatprep.subr.mxu0 %v2577_v8 }
 0x6fb   : > { %1967 = vmatpush1.msra.mxu0 %v2374_v57 }
 0x6fc   : > { %1968 = vmatprep.subr.mxu0 %v2577_v8 }
 0x6fd   : > { %1969 = vmatpush1.msra.mxu0 %v2373_v58 }
 0x6fe   : > { %1970 = vmatprep.subr.mxu0 %v2577_v8 }
 0x6ff   : > { %1971 = vmatpush1.msra.mxu0 %v2372_v59 }
 0x700   : > { %1972 = vmatprep.subr.mxu0 %v2577_v8 }
 0x701   : > { %1973 = vmatpush1.msra.mxu0 %v2371_v14 }
 0x702   : > { %1974 = vmatprep.subr.mxu0 %v2577_v8 }
 0x703   : > { %1975 = vmatpush1.msra.mxu0 %v2370_v60 }
 0x704   : > { %1976 = vmatprep.subr.mxu0 %v2577_v8 }
 0x705   : > { %1977 = vmatpush1.msra.mxu0 %v2369_v61 }
 0x706   : > { %1978 = vmatprep.subr.mxu0 %v2577_v8 }
 0x707   : > { %1979 = vmatpush1.msra.mxu0 %v2368_v62 }
 0x708   : > { %1980 = vmatprep.subr.mxu0 %v2577_v8 }
 0x709   : > { %1981 = vmatpush1.msra.mxu0 %v2367_v63 }
 0x70a   : > { %1982 = vmatprep.subr.mxu0 %v2577_v8 }
 0x70b   : > { %1983 = vmatpush1.msra.mxu0 %v2366_v0 }
 0x70c   : > { %1984 = vmatprep.subr.mxu0 %v2577_v8 }
 0x70d   : > { %1985 = vmatpush1.msra.mxu0 %v2365_v5 }
 0x70e   : > { %1986 = vmatprep.subr.mxu0 %v2577_v8 }
 0x70f   : > { %1987 = vmatpush1.msra.mxu0 %v2364_v6 }
 0x710   : > { %1988 = vmatprep.subr.mxu0 %v2577_v8 }
 0x711   : > { %1989 = vmatpush1.msra.mxu0 %v2363_v9 }
 0x712   : > { %1990 = vmatprep.subr.mxu0 %v2577_v8 }
 0x713   : > { %1991 = vmatpush1.msra.mxu0 %v2362_v10 }
 0x714   : > { %2000 = vmatprep.subr.mxu0 %v2577_v8 }
 0x715   : > { %2001 = vmatpush2.msra.mxu0 %v2389_v11 }
 0x716   : > { %2002 = vmatprep.subr.mxu0 %v2577_v8 }
 0x717   : > { %2003 = vmatpush2.msra.mxu0 %v2388_v12 }
 0x718   : > { %2004 = vmatprep.subr.mxu0 %v2577_v8 }
 0x719   : > { %2005 = vmatpush2.msra.mxu0 %v2387_v13 }
 0x71a   : > { %2006 = vmatprep.subr.mxu0 %v2577_v8 }
 0x71b   : > { %2007 = vmatpush2.msra.mxu0 %v2386_v16 }
 0x71c   : > { %2008 = vmatprep.subr.mxu0 %v2577_v8 }
 0x71d   : > { %2009 = vmatpush2.msra.mxu0 %v2385_v17 }
 0x71e   : > { %2010 = vmatprep.subr.mxu0 %v2577_v8 }
 0x71f   : > { %2011 = vmatpush2.msra.mxu0 %v2384_v18 }
 0x720   : > { %2012 = vmatprep.subr.mxu0 %v2577_v8 }
 0x721   : > { %2013 = vmatpush2.msra.mxu0 %v2383_v21 }
 0x722   : > { %2014 = vmatprep.subr.mxu0 %v2577_v8 }
 0x723   : > { %2015 = vmatpush2.msra.mxu0 %v2382_v22 }
 0x724   : > { %2016 = vmatprep.subr.mxu0 %v2577_v8 }
 0x725   : > { %2017 = vmatpush2.msra.mxu0 %v2381_v23 }
 0x726   : > { %2018 = vmatprep.subr.mxu0 %v2577_v8 }
 0x727   : > { %2019 = vmatpush2.msra.mxu0 %v2380_v24 }
 0x728   : > { %2020 = vmatprep.subr.mxu0 %v2577_v8 }
 0x729   : > { %2021 = vmatpush2.msra.mxu0 %v2379_v25 }
 0x72a   : > { %2022 = vmatprep.subr.mxu0 %v2577_v8 }
 0x72b   : > { %2023 = vmatpush2.msra.mxu0 %v2378_v7 }
 0x72c   : > { %2025 = vmatmul.mubr.f32.vlgmr.msra.gmra.mxu0 %v2909_v15 }
 0x72d   : > { %2391 = vmatprep.mubr.msk.f32.mxu0 %vm420_vm0, %v2916_v19 }
 0x730   : > { %2030 = vmatmul.mubr.f32.gmra.mxu0 %v2918_v20 }
 0x7b4   : > { %v2454_v27 = vpop.f32.mrf.mxu0 }
 0x7b5   : > { %v1928_v28 = vadd.f32 %v2454_v27, %v3212_v38 }
 0x7b6   : > { %v1908_v29 = vpop.f32.mrf.mxu0 }
 0x7b7   : > { %v1927_v8 = vadd.f32 %v1908_v29, %v3215_v41 }
 0x7b8   : > { %v2457_v30 = vpop.f32.mrf.mxu0 }
 0x7b9   : > { %v1930_v15 = vadd.f32 %v2457_v30, %v3218_v44 }
 0x7ba   : > { %v1918_v31 = vpop.f32.mrf.mxu0 }
 0x7bb   : > { %v1929_v19 = vadd.f32 %v1918_v31, %v3220_v46 }
 0x7ec   : > { %v2026_v32 = vpop.f32.mrf.mxu0 }
 0x7ee   : > { %v2028_v20 = vpop.f32.mrf.mxu0 }
 0x7f0   : > { %v2031_v35 = vpop.f32.mrf.mxu0 }
 0x7f1   : > { %2458 = vmatprep.subr.msk.mxu1 %vm1406_vm4, %v2031_v35 }
 0x7f2   : > { %v2033_v33 = vpop.f32.mrf.mxu0  ;;  %2459 = vmatpush3.msk.msra.mxu1 %vm1406_vm4, %v2031_v35 }
 0x7f3   : > { %2460 = vmatprep.subr.mxu1 %v2026_v32 }
 0x7f4   : > { %2461 = vmatpush3.msra.mxu1 %v2026_v32 }
 0x7f5   : > { %2463 = vmatmul.mubr.msk.f32.vlgmr.msra.gmra.mxu1 %vm1393_vm3, %v2393_v1 }
 0x7f6   : > { %2465 = vmatprep.mubr.msk.f32.mxu1 %vm1393_vm3, %v2394_v34 }
 0x7f9   : > { %2466 = vmatmul.mubr.msk.f32.gmra.mxu1 %vm1393_vm3, %v2395_v2 }
 0x8b5   : > { %v2464_v36 = vpop.f32.mrf.mxu1 }
 0x8b6   : > { %v2141_v3 = vadd.f32 %v2464_v36, %v1928_v28 }
 0x8b7   : > { %v2121_v37 = vpop.f32.mrf.mxu1 }
 0x8b8   : > { %v2145_v4 = vsub.f32 0.0, %v2141_v3  ;;  %v2140_v38 = vadd.f32 %v2121_v37, %v1927_v8 }
 0x8b9   : > { %v2467_v39 = vpop.f32.mrf.mxu1 }
 0x8ba   : > { %v2150_v40 = vmul.f32 1.442695, %v2145_v4  ;;  %v2144_v41 = vsub.f32 0.0, %v2140_v38  ;;  %v2143_v42 = vadd.f32 %v2467_v39, %v1930_v15 }
 0x8bb   : > { %v2131_v43 = vpop.f32.mrf.mxu1 }
 0x8bc   : > { %2500 = vpow2.f32 %v2150_v40  ;;  %v2148_v44 = vmul.f32 1.442695, %v2144_v41  ;;  %v2147_v45 = vsub.f32 0.0, %v2143_v42  ;;  %v2142_v46 = vadd.f32 %v2131_v43, %v1929_v19 }
 0x8be   : > { %2502 = vpow2.f32 %v2148_v44  ;;  %v2154_v47 = vmul.f32 1.442695, %v2147_v45  ;;  %v2146_v48 = vsub.f32 0.0, %v2142_v46 }
 0x8c0   : > { %2504 = vpow2.f32 %v2154_v47  ;;  %v2152_v49 = vmul.f32 1.442695, %v2146_v48 }
 0x8c2   : > { %2506 = vpow2.f32 %v2152_v49 }
 0x8c9   : > { %v2501_v50 = vpop.eup %2500 }
 0x8ca   : > { %v2157_v51 = vadd.f32 1.0, %v2501_v50 }
 0x8cb   : > { %v2503_v52 = vpop.eup %2502 }
 0x8cc   : > { %2508 = vrcp.f32 %v2157_v51  ;;  %v2156_v53 = vadd.f32 1.0, %v2503_v52 }
 0x8cd   : > { %v2505_v54 = vpop.eup %2504 }
 0x8ce   : > { %2510 = vrcp.f32 %v2156_v53  ;;  %v2159_v55 = vadd.f32 1.0, %v2505_v54 }
 0x8cf   : > { %v2507_v56 = vpop.eup %2506 }
 0x8d0   : > { %2512 = vrcp.f32 %v2159_v55  ;;  %v2158_v57 = vadd.f32 1.0, %v2507_v56 }
 0x8d2   : > { %2514 = vrcp.f32 %v2158_v57 }
 0x8d9   : > { %v2509_v58 = vpop.eup %2508 }
 0x8da   : > { %2166 = vst.msk [vmem:[%s341_s16 + $0x8] sm:$0xff] %vm2164_vm5, %v2509_v58 }
 0x8db   : > { %v2511_v59 = vpop.eup %2510 }
 0x8dc   : > { %2165 = vst.msk [vmem:[%s341_s16] sm:$0xff] %vm2164_vm5, %v2511_v59 }
 0x8dd   : > { %v2513_v14 = vpop.eup %2512 }
 0x8de   : > { %2169 = vst.msk [vmem:[%s341_s16 + $0x18] sm:$0xf] %vm2168_vm6, %v2513_v14 }
 0x8df   : > { %v2515_v60 = vpop.eup %2514 }
 0x8e0   : > { %2167 = vst.msk [vmem:[%s341_s16 + $0x10] sm:$0xff] %vm2164_vm5, %v2515_v60 }
 0x8e1 PF: > { %s21_s30 = sadd.s32 1, %s2571_s30  }
 0x8e2   : > { %p18_p11 = scmp.ge.s32.totalorder %s21_s30, 4  }
 0x8e4   :  { %20 = sbr.rel (!%p18_p11) target bundleno = 2 (0x2), region = 106 }
 0x8e9   :  { %2191 = vsyncpa [#allocation3], 1 }
 0x8ea   :  { %2193 = vsyncpa [#allocation3 + $0x1], 1 }
 0x8eb   :  { %2194 = vsyncpa [#allocation4], 1 }
 0x8ec   :  { %2196 = vsyncpa [#allocation4 + $0x1], 1 }

</bundles_post_ra>
